<compile_context>
chip_gen: v7x
topology: tpu7x:2x2x1
jax: 0.10.0
libtpu: 0.0.40
codegen_flags: <defaults>
</compile_context>

<pallas_src>
import functools
import math

import numpy as np

import jax
import jax.numpy as jnp
from jax.experimental import pallas as pl
from jax.experimental.pallas import tpu as pltpu


# ----------------------------- fused Pallas kernel -------------------------

def _psa_fused_kernel(xq_ref, xp_ref, wq_ref, bq_ref, wkv_ref, bkv_ref,
                      maskf_ref, bias_ref, wp_ref, bp_ref, o_ref,
                      *, compute_dtype=None):
    wb, n, c = xq_ref.shape            # windows per grid step, tokens, channels
    n4 = xp_ref.shape[1]               # tokens in the permuted (half-res) window
    c4x = xp_ref.shape[2]              # 4 * c
    hk = bias_ref.shape[1]             # num_heads * n4
    nh = hk // n4                      # num_heads
    f32 = jnp.float32

    def cast(a):
        return a.astype(compute_dtype) if compute_dtype is not None else a

    # ---- q projection (1/sqrt(hd) scale pre-folded into wq/bq) ----
    xq = xq_ref[...].reshape(wb * n, c)
    q = jnp.dot(cast(xq), cast(wq_ref[...]), preferred_element_type=f32) + bq_ref[...]
    q = q.reshape(wb, n, c)                               # heads live on the lane axis

    # ---- fused k/v projection; the 2x2 token permutation is folded into wkv ----
    xp = xp_ref[...].reshape(wb * n4, c4x)
    kv = jnp.dot(cast(xp), cast(wkv_ref[...]), preferred_element_type=f32) + bkv_ref[...]
    kv = kv.reshape(wb, n4, 2 * c)
    kc = kv[:, :, :c]                                     # (wb, n4, c) head-concat k
    vc = kv[:, :, c:]                                     # (wb, n4, c) head-concat v

    # ---- head-blocked K / V so one MXU matmul per window covers every head ----
    maskf = maskf_ref[...][None]                          # (1, H*n4, c) 0/1 head mask
    k_big = jnp.tile(kc, (1, nh, 1)) * maskf              # (wb, H*n4, c)
    v_big = jnp.tile(vc, (1, nh, 1)) * maskf              # (wb, H*n4, c)

    # ---- scores for all heads at once; contraction on last axes (no k.T) ----
    s = jnp.einsum('wic,wjc->wij', cast(q), cast(k_big),
                   preferred_element_type=f32)            # (wb, n, H*n4)
    s = s + bias_ref[...][None]                           # resident rel-pos bias

    # ---- segmented softmax: one n4-wide segment per head ----
    probs = []
    for h in range(nh):
        sh = s[:, :, h * n4:(h + 1) * n4]
        sh = sh - jnp.max(sh, axis=-1, keepdims=True)
        eh = jnp.exp(sh)
        inv = pl.reciprocal(jnp.sum(eh, axis=-1, keepdims=True), approx=True)
        probs.append(eh * inv)
    p = jnp.concatenate(probs, axis=-1)                   # (wb, n, H*n4)

    # ---- attn @ v : heads land directly back on the channel axis ----
    o = jnp.einsum('wij,wjc->wic', cast(p), cast(v_big),
                   preferred_element_type=f32)            # (wb, n, c)

    # ---- output projection ----
    y = jnp.dot(cast(o.reshape(wb * n, c)), cast(wp_ref[...]),
                preferred_element_type=f32) + bp_ref[...]
    o_ref[...] = y.reshape(wb, n, c).astype(o_ref.dtype)
    # TODO(synk): attn_drop / proj_drop have p=0.0 (eval) -> identity; mask=None path only.


# --------------------------- module setup / plan -----------------------------

def make_aligned_relative_position_index(window_size):
    """Reproduces PSA.__init__'s aligned_relative_position_index buffer."""
    pw0, pw1 = window_size[0] // 2, window_size[1] // 2
    coords_h = jnp.arange(pw0)
    coords_w = jnp.arange(pw1)
    coords = jnp.stack(jnp.meshgrid(coords_h, coords_w, indexing="ij"))   # (2, pw0, pw1)
    coords_flatten = coords.reshape(2, -1)                                # (2, N4)
    rel = coords_flatten[:, :, None] - coords_flatten[:, None, :]         # (2, N4, N4)
    rel = rel.transpose(1, 2, 0)                                          # (N4, N4, 2)
    rel = rel.at[:, :, 0].add(pw0 - 1)
    rel = rel.at[:, :, 1].add(pw1 - 1)
    rel = rel.at[:, :, 0].multiply(2 * pw1 - 1)
    idx = rel.sum(-1)                                                     # (N4, N4)
    aligned = idx.reshape(pw0, pw1, 1, 1, pw0 * pw1)
    aligned = jnp.tile(aligned, (1, 1, 2, 2, 1))
    aligned = aligned.transpose(0, 2, 1, 3, 4).reshape(4 * pw0 * pw1, pw0 * pw1)
    return aligned


def init_psa_params(key, dim, window_size, num_heads, dtype=jnp.float32):
    pw0, pw1 = window_size[0] // 2, window_size[1] // 2
    ks = jax.random.split(key, 8)

    def lin_init(kw, kb, fan_in, fan_out):
        bound = 1.0 / math.sqrt(fan_in)
        w = jax.random.uniform(kw, (fan_in, fan_out), dtype, -bound, bound)
        b = jax.random.uniform(kb, (fan_out,), dtype, -bound, bound)
        return w, b

    kv_w, kv_b = lin_init(ks[0], ks[1], dim, dim // 2)
    q_w, q_b = lin_init(ks[2], ks[3], dim, dim)
    proj_w, proj_b = lin_init(ks[4], ks[5], dim, dim)
    table = 0.02 * jax.random.truncated_normal(
        ks[6], -2.0, 2.0, ((2 * pw0 - 1) * (2 * pw1 - 1), num_heads), dtype)
    return {
        "kv_w": kv_w, "kv_b": kv_b,
        "q_w": q_w, "q_b": q_b,
        "proj_w": proj_w, "proj_b": proj_b,
        "rpb_table": table,
        "rpi": make_aligned_relative_position_index(window_size),
    }


def build_psa_plan(params, dim, window_size, num_heads):
    """One-time precompute: scale-folded q weights, permutation-absorbed kv
    weights, head mask, gathered relative-position bias (all kernel-ready)."""
    c = dim
    pw0, pw1 = window_size[0] // 2, window_size[1] // 2
    n = window_size[0] * window_size[1]
    n4 = pw0 * pw1
    hd = c // num_heads
    c4 = c // 4
    scale = float(hd) ** (-0.5)

    # (1) fold the 1/sqrt(hd) scale into the q projection.
    wq = np.asarray(params["q_w"]) * scale                       # (c, c)
    bq = (np.asarray(params["q_b"]) * scale)[None, :]            # (1, c)

    # (2) absorb the SRFormer 2x2 sub-token permutation into a (4c, 2c) weight
    #     acting on the regrouped input xp[w, p, sub*c + i] = x[w, tok(p,sub), i].
    e = np.arange(c)
    h_s = e // (2 * c4)
    w_s = (e % (2 * c4)) // c4
    ch = e % c4
    sub = h_s * 2 + w_s                                          # sub-token feeding channel e
    kv_w = np.asarray(params["kv_w"])                            # (c, c//2)
    kv_b = np.asarray(params["kv_b"])                            # (c//2,)
    wk = np.zeros((4 * c, c), kv_w.dtype)
    wv = np.zeros((4 * c, c), kv_w.dtype)
    for ei in range(c):
        wk[sub[ei] * c:(sub[ei] + 1) * c, ei] = kv_w[:, ch[ei]]
        wv[sub[ei] * c:(sub[ei] + 1) * c, ei] = kv_w[:, c4 + ch[ei]]
    wkv = np.concatenate([wk, wv], axis=1)                       # (4c, 2c)
    bkv = np.concatenate([kv_b[ch], kv_b[c4 + ch]])[None, :]     # (1, 2c)

    # (3) per-head channel mask in the (H*n4, c) key-block layout.
    head_of_c = np.arange(c) // hd
    maskf = (head_of_c[None, :] == (np.arange(num_heads * n4) // n4)[:, None])
    maskf = maskf.astype(np.float32)                             # (H*n4, c)

    # (4) relative-position bias gathered once, laid out as (n, H*n4).
    table = np.asarray(params["rpb_table"])
    rpi = np.asarray(params["rpi"]).reshape(-1)
    bias = table[rpi].reshape(n, n4, num_heads)                  # (n, n4, H)
    bias = np.transpose(bias, (0, 2, 1)).reshape(n, num_heads * n4).astype(np.float32)

    return {
        "wq": jnp.asarray(wq), "bq": jnp.asarray(bq),
        "wkv": jnp.asarray(wkv), "bkv": jnp.asarray(bkv),
        "maskf": jnp.asarray(maskf), "bias": jnp.asarray(bias),
        "wp": jnp.asarray(params["proj_w"]),
        "bp": jnp.asarray(params["proj_b"])[None, :],
    }


# ------------------------------- forward ------------------------------------

def psa_forward(plan, x, window_size, num_heads, compute_dtype=None):
    """Fused Pallas implementation of PSA.forward (mask=None, dropout eval)."""
    b_, n, c = x.shape
    pw0, pw1 = window_size[0] // 2, window_size[1] // 2
    n4 = pw0 * pw1
    hk = num_heads * n4

    # Token regroup (single XLA transpose): each 2x2 group's 4 tokens are
    # concatenated on the lane axis so the permutation-absorbed wkv produces
    # head-major k/v rows directly inside the kernel.
    xp = x.reshape(b_, pw0, 2, pw1, 2, c).transpose(0, 1, 3, 2, 4, 5)
    xp = xp.reshape(b_, n4, 4 * c)

    wb = next(d for d in (16, 8, 4, 2, 1) if b_ % d == 0)    # windows per grid step

    kernel = functools.partial(_psa_fused_kernel, compute_dtype=compute_dtype)
    return pl.pallas_call(
        kernel,
        out_shape=jax.ShapeDtypeStruct((b_, n, c), x.dtype),
        grid=(b_ // wb,),
        in_specs=[
            pl.BlockSpec((wb, n, c), lambda i: (i, 0, 0)),       # x  (query tokens)
            pl.BlockSpec((wb, n4, 4 * c), lambda i: (i, 0, 0)),  # xp (regrouped kv tokens)
            pl.BlockSpec((c, c), lambda i: (0, 0)),              # wq  (resident)
            pl.BlockSpec((1, c), lambda i: (0, 0)),              # bq
            pl.BlockSpec((4 * c, 2 * c), lambda i: (0, 0)),      # wkv (resident)
            pl.BlockSpec((1, 2 * c), lambda i: (0, 0)),          # bkv
            pl.BlockSpec((hk, c), lambda i: (0, 0)),             # head mask
            pl.BlockSpec((n, hk), lambda i: (0, 0)),             # rel-pos bias
            pl.BlockSpec((c, c), lambda i: (0, 0)),              # wp
            pl.BlockSpec((1, c), lambda i: (0, 0)),              # bp
        ],
        out_specs=pl.BlockSpec((wb, n, c), lambda i: (i, 0, 0)),
        compiler_params=pltpu.CompilerParams(
            dimension_semantics=("parallel",),
            vmem_limit_bytes=32 * 1024 * 1024),
    )(x, xp, plan["wq"], plan["bq"], plan["wkv"], plan["bkv"],
      plan["maskf"], plan["bias"], plan["wp"], plan["bp"])


# --------------------------- pure-JAX reference -----------------------------

def psa_reference(params, x, window_size, num_heads):
    b_, n, c = x.shape
    pw0, pw1 = window_size[0] // 2, window_size[1] // 2
    n4 = pw0 * pw1
    hd = c // num_heads
    scale = hd ** (-0.5)

    kv = (x @ params["kv_w"] + params["kv_b"]).reshape(b_, pw0, 2, pw1, 2, 2, c // 4)
    kv = kv.transpose(0, 1, 3, 5, 2, 4, 6).reshape(b_, n4, 2, num_heads, hd).transpose(2, 0, 3, 1, 4)
    k, v = kv[0], kv[1]
    q = (x @ params["q_w"] + params["q_b"]).reshape(b_, n, num_heads, hd).transpose(0, 2, 1, 3) * scale

    attn = q @ jnp.swapaxes(k, -2, -1)
    bias = params["rpb_table"][params["rpi"].reshape(-1)].reshape(n, n4, num_heads).transpose(2, 0, 1)
    attn = attn + bias[None]
    attn = jax.nn.softmax(attn, axis=-1)
    out = (attn @ v).transpose(0, 2, 1, 3).reshape(b_, n, c)
    return out @ params["proj_w"] + params["proj_b"]


# --------------------------------- main -------------------------------------

if __name__ == "__main__":
    dim = 32
    window_size = (8, 8)     # n = 64 tokens per window, permuted window 4x4 -> n//4 = 16
    num_heads = 4
    b_windows = 2

    key = jax.random.PRNGKey(0)
    k_param, k_x = jax.random.split(key)
    params = init_psa_params(k_param, dim, window_size, num_heads)
    plan = build_psa_plan(params, dim, window_size, num_heads)
    x = jax.random.normal(k_x, (b_windows, window_size[0] * window_size[1], dim), jnp.float32)

    fwd = jax.jit(functools.partial(psa_forward, window_size=window_size, num_heads=num_heads))
    out = jax.block_until_ready(fwd(plan, x))

    ref = psa_reference(params, x, window_size, num_heads)
    assert out.shape == ref.shape == (b_windows, window_size[0] * window_size[1], dim)
    # Tolerance accounts for the EUP approximate reciprocal used in the softmax.
    assert jnp.allclose(out, ref, atol=2e-3, rtol=2e-3), (
        "Pallas output mismatch vs JAX reference; max abs diff = "
        f"{float(jnp.max(jnp.abs(out - ref)))}")

    print("KERNEL_OK")
</pallas_src>

<mosaic_0001>
module attributes {stable_mosaic.version = 11 : i64} {
  func.func @_psa_fused_kernel(%arg0: i32, %arg1: memref<2x64x32xf32, #tpu.memory_space<vmem>>, %arg2: memref<2x16x128xf32, #tpu.memory_space<vmem>>, %arg3: memref<32x32xf32, #tpu.memory_space<vmem>>, %arg4: memref<1x32xf32, #tpu.memory_space<vmem>>, %arg5: memref<128x64xf32, #tpu.memory_space<vmem>>, %arg6: memref<1x64xf32, #tpu.memory_space<vmem>>, %arg7: memref<64x32xf32, #tpu.memory_space<vmem>>, %arg8: memref<64x64xf32, #tpu.memory_space<vmem>>, %arg9: memref<32x32xf32, #tpu.memory_space<vmem>>, %arg10: memref<1x32xf32, #tpu.memory_space<vmem>>, %arg11: memref<2x64x32xf32, #tpu.memory_space<vmem>>) attributes {dimension_semantics = [#tpu.dimension_semantics<parallel>], iteration_bounds = array<i64: 1>, scalar_prefetch = 0 : i64, scratch_operands = 0 : i64, tpu.core_type = #tpu.core_type<tc>, window_params = [{transform_indices = @transform_0, window_bounds = array<i64: 2, 64, 32>}, {transform_indices = @transform_1, window_bounds = array<i64: 2, 16, 128>}, {pipeline_mode = #tpu.pipeline_mode<synchronous>, transform_indices = @transform_2, window_bounds = array<i64: 32, 32>}, {pipeline_mode = #tpu.pipeline_mode<synchronous>, transform_indices = @transform_3, window_bounds = array<i64: 1, 32>}, {pipeline_mode = #tpu.pipeline_mode<synchronous>, transform_indices = @transform_4, window_bounds = array<i64: 128, 64>}, {pipeline_mode = #tpu.pipeline_mode<synchronous>, transform_indices = @transform_5, window_bounds = array<i64: 1, 64>}, {pipeline_mode = #tpu.pipeline_mode<synchronous>, transform_indices = @transform_6, window_bounds = array<i64: 64, 32>}, {pipeline_mode = #tpu.pipeline_mode<synchronous>, transform_indices = @transform_7, window_bounds = array<i64: 64, 64>}, {pipeline_mode = #tpu.pipeline_mode<synchronous>, transform_indices = @transform_8, window_bounds = array<i64: 32, 32>}, {pipeline_mode = #tpu.pipeline_mode<synchronous>, transform_indices = @transform_9, window_bounds = array<i64: 1, 32>}, {transform_indices = @transform_10, window_bounds = array<i64: 2, 64, 32>}]} {
    %c0 = arith.constant 0 : index
    %c0_0 = arith.constant 0 : index
    %c0_1 = arith.constant 0 : index
    %0 = vector.load %arg1[%c0, %c0_0, %c0_1] : memref<2x64x32xf32, #tpu.memory_space<vmem>>, vector<2x64x32xf32>
    %1 = vector.shape_cast %0 : vector<2x64x32xf32> to vector<128x32xf32>
    %c0_2 = arith.constant 0 : index
    %c0_3 = arith.constant 0 : index
    %2 = vector.load %arg3[%c0_2, %c0_3] : memref<32x32xf32, #tpu.memory_space<vmem>>, vector<32x32xf32>
    %cst = arith.constant dense<0.000000e+00> : vector<128x32xf32>
    %3 = tpu.matmul %1, %2, %cst {dimension_numbers = #tpu.dot_dimension_numbers<[1], [0], [0], [1], [0, 0, 1, 1], [], []>} : vector<128x32xf32>, vector<32x32xf32>, vector<128x32xf32> -> vector<128x32xf32>
    %c0_4 = arith.constant 0 : index
    %c0_5 = arith.constant 0 : index
    %4 = vector.load %arg4[%c0_4, %c0_5] : memref<1x32xf32, #tpu.memory_space<vmem>>, vector<1x32xf32>
    %5 = vector.broadcast %4 : vector<1x32xf32> to vector<128x32xf32>
    %6 = arith.addf %3, %5 : vector<128x32xf32>
    %7 = vector.shape_cast %6 : vector<128x32xf32> to vector<2x64x32xf32>
    %c0_6 = arith.constant 0 : index
    %c0_7 = arith.constant 0 : index
    %c0_8 = arith.constant 0 : index
    %8 = vector.load %arg2[%c0_6, %c0_7, %c0_8] : memref<2x16x128xf32, #tpu.memory_space<vmem>>, vector<2x16x128xf32>
    %9 = vector.shape_cast %8 : vector<2x16x128xf32> to vector<32x128xf32>
    %c0_9 = arith.constant 0 : index
    %c0_10 = arith.constant 0 : index
    %10 = vector.load %arg5[%c0_9, %c0_10] : memref<128x64xf32, #tpu.memory_space<vmem>>, vector<128x64xf32>
    %cst_11 = arith.constant dense<0.000000e+00> : vector<32x64xf32>
    %11 = tpu.matmul %9, %10, %cst_11 {dimension_numbers = #tpu.dot_dimension_numbers<[1], [0], [0], [1], [0, 0, 1, 1], [], []>} : vector<32x128xf32>, vector<128x64xf32>, vector<32x64xf32> -> vector<32x64xf32>
    %c0_12 = arith.constant 0 : index
    %c0_13 = arith.constant 0 : index
    %12 = vector.load %arg6[%c0_12, %c0_13] : memref<1x64xf32, #tpu.memory_space<vmem>>, vector<1x64xf32>
    %13 = vector.broadcast %12 : vector<1x64xf32> to vector<32x64xf32>
    %14 = arith.addf %11, %13 : vector<32x64xf32>
    %15 = vector.shape_cast %14 : vector<32x64xf32> to vector<2x16x64xf32>
    %16 = vector.extract_strided_slice %15 {offsets = [0, 0, 0], sizes = [2, 16, 32], strides = [1, 1, 1]} : vector<2x16x64xf32> to vector<2x16x32xf32>
    %17 = vector.extract_strided_slice %15 {offsets = [0, 0, 32], sizes = [2, 16, 32], strides = [1, 1, 1]} : vector<2x16x64xf32> to vector<2x16x32xf32>
    %c0_14 = arith.constant 0 : index
    %c0_15 = arith.constant 0 : index
    %18 = vector.load %arg7[%c0_14, %c0_15] : memref<64x32xf32, #tpu.memory_space<vmem>>, vector<64x32xf32>
    %19 = vector.shape_cast %18 : vector<64x32xf32> to vector<1x64x32xf32>
    %20 = tpu.concatenate %16, %16, %16, %16 in 1 : vector<2x16x32xf32>, vector<2x16x32xf32>, vector<2x16x32xf32>, vector<2x16x32xf32> -> vector<2x64x32xf32>
    %21 = vector.broadcast %19 : vector<1x64x32xf32> to vector<2x64x32xf32>
    %22 = arith.mulf %20, %21 : vector<2x64x32xf32>
    %23 = tpu.concatenate %17, %17, %17, %17 in 1 : vector<2x16x32xf32>, vector<2x16x32xf32>, vector<2x16x32xf32>, vector<2x16x32xf32> -> vector<2x64x32xf32>
    %24 = vector.broadcast %19 : vector<1x64x32xf32> to vector<2x64x32xf32>
    %25 = arith.mulf %23, %24 : vector<2x64x32xf32>
    "tpu.trace_start"() <{level = 10 : i32, message = "wic,wjc->wij"}> : () -> ()
    %cst_16 = arith.constant dense<0.000000e+00> : vector<2x64x64xf32>
    %26 = tpu.matmul %7, %22, %cst_16 {dimension_numbers = #tpu.dot_dimension_numbers<[2], [2], [1], [1], [0, 0, 0, 1, 1, 1], [0], [0]>} : vector<2x64x32xf32>, vector<2x64x32xf32>, vector<2x64x64xf32> -> vector<2x64x64xf32>
    "tpu.trace_stop"() : () -> ()
    %c0_17 = arith.constant 0 : index
    %c0_18 = arith.constant 0 : index
    %27 = vector.load %arg8[%c0_17, %c0_18] : memref<64x64xf32, #tpu.memory_space<vmem>>, vector<64x64xf32>
    %28 = vector.shape_cast %27 : vector<64x64xf32> to vector<1x64x64xf32>
    %29 = vector.broadcast %28 : vector<1x64x64xf32> to vector<2x64x64xf32>
    %30 = arith.addf %26, %29 : vector<2x64x64xf32>
    %31 = vector.extract_strided_slice %30 {offsets = [0, 0, 0], sizes = [2, 64, 16], strides = [1, 1, 1]} : vector<2x64x64xf32> to vector<2x64x16xf32>
    %cst_19 = arith.constant dense<0xFF800000> : vector<2x64xf32>
    %32 = vector.multi_reduction <maximumf>, %31, %cst_19 [2] : vector<2x64x16xf32> to vector<2x64xf32>
    %33 = vector.shape_cast %32 : vector<2x64xf32> to vector<2x64x1xf32>
    %34 = vector.broadcast %33 : vector<2x64x1xf32> to vector<2x64x16xf32>
    %35 = arith.subf %31, %34 : vector<2x64x16xf32>
    %36 = math.exp %35 : vector<2x64x16xf32>
    %cst_20 = arith.constant dense<0.000000e+00> : vector<2x64xf32>
    %37 = vector.multi_reduction <add>, %36, %cst_20 [2] : vector<2x64x16xf32> to vector<2x64xf32>
    %38 = vector.shape_cast %37 : vector<2x64xf32> to vector<2x64x1xf32>
    %39 = tpu.reciprocal %38 {approx = true} : vector<2x64x1xf32> -> vector<2x64x1xf32>
    %40 = vector.broadcast %39 : vector<2x64x1xf32> to vector<2x64x16xf32>
    %41 = arith.mulf %36, %40 : vector<2x64x16xf32>
    %42 = vector.extract_strided_slice %30 {offsets = [0, 0, 16], sizes = [2, 64, 16], strides = [1, 1, 1]} : vector<2x64x64xf32> to vector<2x64x16xf32>
    %cst_21 = arith.constant dense<0xFF800000> : vector<2x64xf32>
    %43 = vector.multi_reduction <maximumf>, %42, %cst_21 [2] : vector<2x64x16xf32> to vector<2x64xf32>
    %44 = vector.shape_cast %43 : vector<2x64xf32> to vector<2x64x1xf32>
    %45 = vector.broadcast %44 : vector<2x64x1xf32> to vector<2x64x16xf32>
    %46 = arith.subf %42, %45 : vector<2x64x16xf32>
    %47 = math.exp %46 : vector<2x64x16xf32>
    %cst_22 = arith.constant dense<0.000000e+00> : vector<2x64xf32>
    %48 = vector.multi_reduction <add>, %47, %cst_22 [2] : vector<2x64x16xf32> to vector<2x64xf32>
    %49 = vector.shape_cast %48 : vector<2x64xf32> to vector<2x64x1xf32>
    %50 = tpu.reciprocal %49 {approx = true} : vector<2x64x1xf32> -> vector<2x64x1xf32>
    %51 = vector.broadcast %50 : vector<2x64x1xf32> to vector<2x64x16xf32>
    %52 = arith.mulf %47, %51 : vector<2x64x16xf32>
    %53 = vector.extract_strided_slice %30 {offsets = [0, 0, 32], sizes = [2, 64, 16], strides = [1, 1, 1]} : vector<2x64x64xf32> to vector<2x64x16xf32>
    %cst_23 = arith.constant dense<0xFF800000> : vector<2x64xf32>
    %54 = vector.multi_reduction <maximumf>, %53, %cst_23 [2] : vector<2x64x16xf32> to vector<2x64xf32>
    %55 = vector.shape_cast %54 : vector<2x64xf32> to vector<2x64x1xf32>
    %56 = vector.broadcast %55 : vector<2x64x1xf32> to vector<2x64x16xf32>
    %57 = arith.subf %53, %56 : vector<2x64x16xf32>
    %58 = math.exp %57 : vector<2x64x16xf32>
    %cst_24 = arith.constant dense<0.000000e+00> : vector<2x64xf32>
    %59 = vector.multi_reduction <add>, %58, %cst_24 [2] : vector<2x64x16xf32> to vector<2x64xf32>
    %60 = vector.shape_cast %59 : vector<2x64xf32> to vector<2x64x1xf32>
    %61 = tpu.reciprocal %60 {approx = true} : vector<2x64x1xf32> -> vector<2x64x1xf32>
    %62 = vector.broadcast %61 : vector<2x64x1xf32> to vector<2x64x16xf32>
    %63 = arith.mulf %58, %62 : vector<2x64x16xf32>
    %64 = vector.extract_strided_slice %30 {offsets = [0, 0, 48], sizes = [2, 64, 16], strides = [1, 1, 1]} : vector<2x64x64xf32> to vector<2x64x16xf32>
    %cst_25 = arith.constant dense<0xFF800000> : vector<2x64xf32>
    %65 = vector.multi_reduction <maximumf>, %64, %cst_25 [2] : vector<2x64x16xf32> to vector<2x64xf32>
    %66 = vector.shape_cast %65 : vector<2x64xf32> to vector<2x64x1xf32>
    %67 = vector.broadcast %66 : vector<2x64x1xf32> to vector<2x64x16xf32>
    %68 = arith.subf %64, %67 : vector<2x64x16xf32>
    %69 = math.exp %68 : vector<2x64x16xf32>
    %cst_26 = arith.constant dense<0.000000e+00> : vector<2x64xf32>
    %70 = vector.multi_reduction <add>, %69, %cst_26 [2] : vector<2x64x16xf32> to vector<2x64xf32>
    %71 = vector.shape_cast %70 : vector<2x64xf32> to vector<2x64x1xf32>
    %72 = tpu.reciprocal %71 {approx = true} : vector<2x64x1xf32> -> vector<2x64x1xf32>
    %73 = vector.broadcast %72 : vector<2x64x1xf32> to vector<2x64x16xf32>
    %74 = arith.mulf %69, %73 : vector<2x64x16xf32>
    %75 = tpu.concatenate %41, %52, %63, %74 in 2 : vector<2x64x16xf32>, vector<2x64x16xf32>, vector<2x64x16xf32>, vector<2x64x16xf32> -> vector<2x64x64xf32>
    "tpu.trace_start"() <{level = 10 : i32, message = "wij,wjc->wic"}> : () -> ()
    %cst_27 = arith.constant dense<0.000000e+00> : vector<2x64x32xf32>
    %76 = tpu.matmul %75, %25, %cst_27 {dimension_numbers = #tpu.dot_dimension_numbers<[2], [1], [1], [2], [0, 0, 0, 1, 1, 2], [0], [0]>} : vector<2x64x64xf32>, vector<2x64x32xf32>, vector<2x64x32xf32> -> vector<2x64x32xf32>
    "tpu.trace_stop"() : () -> ()
    %77 = vector.shape_cast %76 : vector<2x64x32xf32> to vector<128x32xf32>
    %c0_28 = arith.constant 0 : index
    %c0_29 = arith.constant 0 : index
    %78 = vector.load %arg9[%c0_28, %c0_29] : memref<32x32xf32, #tpu.memory_space<vmem>>, vector<32x32xf32>
    %cst_30 = arith.constant dense<0.000000e+00> : vector<128x32xf32>
    %79 = tpu.matmul %77, %78, %cst_30 {dimension_numbers = #tpu.dot_dimension_numbers<[1], [0], [0], [1], [0, 0, 1, 1], [], []>} : vector<128x32xf32>, vector<32x32xf32>, vector<128x32xf32> -> vector<128x32xf32>
    %c0_31 = arith.constant 0 : index
    %c0_32 = arith.constant 0 : index
    %80 = vector.load %arg10[%c0_31, %c0_32] : memref<1x32xf32, #tpu.memory_space<vmem>>, vector<1x32xf32>
    %81 = vector.broadcast %80 : vector<1x32xf32> to vector<128x32xf32>
    %82 = arith.addf %79, %81 : vector<128x32xf32>
    %83 = vector.shape_cast %82 : vector<128x32xf32> to vector<2x64x32xf32>
    %c0_33 = arith.constant 0 : index
    %c0_34 = arith.constant 0 : index
    %c0_35 = arith.constant 0 : index
    %84 = vector.load %arg11[%c0_33, %c0_34, %c0_35] : memref<2x64x32xf32, #tpu.memory_space<vmem>>, vector<2x64x32xf32>
    tpu.vector_store %arg11[%c0_33, %c0_34, %c0_35], %83 {strides = array<i32>} : memref<2x64x32xf32, #tpu.memory_space<vmem>>, vector<2x64x32xf32>,
    return
  }
  func.func @transform_0(%arg0: i32) -> (i32, i32, i32) {
    %c0_i32 = arith.constant 0 : i32
    %c0_i32_0 = arith.constant 0 : i32
    %c0_i32_1 = arith.constant 0 : i32
    return %arg0, %c0_i32, %c0_i32_0 : i32, i32, i32
  }
  func.func @transform_1(%arg0: i32) -> (i32, i32, i32) {
    %c0_i32 = arith.constant 0 : i32
    %c0_i32_0 = arith.constant 0 : i32
    %c0_i32_1 = arith.constant 0 : i32
    return %arg0, %c0_i32, %c0_i32_0 : i32, i32, i32
  }
  func.func @transform_2(%arg0: i32) -> (i32, i32) {
    %c0_i32 = arith.constant 0 : i32
    %c0_i32_0 = arith.constant 0 : i32
    %c0_i32_1 = arith.constant 0 : i32
    return %c0_i32, %c0_i32_0 : i32, i32
  }
  func.func @transform_3(%arg0: i32) -> (i32, i32) {
    %c0_i32 = arith.constant 0 : i32
    %c0_i32_0 = arith.constant 0 : i32
    %c0_i32_1 = arith.constant 0 : i32
    return %c0_i32, %c0_i32_0 : i32, i32
  }
  func.func @transform_4(%arg0: i32) -> (i32, i32) {
    %c0_i32 = arith.constant 0 : i32
    %c0_i32_0 = arith.constant 0 : i32
    %c0_i32_1 = arith.constant 0 : i32
    return %c0_i32, %c0_i32_0 : i32, i32
  }
  func.func @transform_5(%arg0: i32) -> (i32, i32) {
    %c0_i32 = arith.constant 0 : i32
    %c0_i32_0 = arith.constant 0 : i32
    %c0_i32_1 = arith.constant 0 : i32
    return %c0_i32, %c0_i32_0 : i32, i32
  }
  func.func @transform_6(%arg0: i32) -> (i32, i32) {
    %c0_i32 = arith.constant 0 : i32
    %c0_i32_0 = arith.constant 0 : i32
    %c0_i32_1 = arith.constant 0 : i32
    return %c0_i32, %c0_i32_0 : i32, i32
  }
  func.func @transform_7(%arg0: i32) -> (i32, i32) {
    %c0_i32 = arith.constant 0 : i32
    %c0_i32_0 = arith.constant 0 : i32
    %c0_i32_1 = arith.constant 0 : i32
    return %c0_i32, %c0_i32_0 : i32, i32
  }
  func.func @transform_8(%arg0: i32) -> (i32, i32) {
    %c0_i32 = arith.constant 0 : i32
    %c0_i32_0 = arith.constant 0 : i32
    %c0_i32_1 = arith.constant 0 : i32
    return %c0_i32, %c0_i32_0 : i32, i32
  }
  func.func @transform_9(%arg0: i32) -> (i32, i32) {
    %c0_i32 = arith.constant 0 : i32
    %c0_i32_0 = arith.constant 0 : i32
    %c0_i32_1 = arith.constant 0 : i32
    return %c0_i32, %c0_i32_0 : i32, i32
  }
  func.func @transform_10(%arg0: i32) -> (i32, i32, i32) {
    %c0_i32 = arith.constant 0 : i32
    %c0_i32_0 = arith.constant 0 : i32
    %c0_i32_1 = arith.constant 0 : i32
    return %arg0, %c0_i32, %c0_i32_0 : i32, i32, i32
  }
}

</mosaic_0001>

<bundles_post_ra>
// kernel: psa_forward.1
= control target key start
LH: loop header
LB: loop body
LE: loop exit
PB: predicated region body
PF: predicated region fallthrough
CT: control target
= control target key end

     0   :  { %vm62_vm0 = vcmask 261120   ;;  %s3103_s28 = smov 32   ;;  %vm1172_vm2 = vcmask 392448   ;;  %vm931_vm3 = vcmask 261248   ;;  %vm1413_vm4 = vcmask 523648   ;;  %s3106_s20 = smov 80   ;;  %s4638_s4 = inlined_call_operand.vmem [shape: f32[128,64], index: 4, kind: input, shape index: {}]   ;;  %s4639_s1 = inlined_call_operand.vmem [shape: f32[2,16,128], index: 1, kind: input, shape index: {}]   ;;  %s4640_s2 = inlined_call_operand.vmem [shape: f32[32,32], index: 2, kind: input, shape index: {}]   ;;  %s4641_s0 = inlined_call_operand.vmem [shape: f32[2,64,32], index: 0, kind: input, shape index: {}]   ;;  %s4642_s6 = inlined_call_operand.vmem [shape: f32[64,32], index: 6, kind: input, shape index: {}]   ;;  %s4643_s3 = inlined_call_operand.vmem [shape: f32[1,32], index: 3, kind: input, shape index: {}]   ;;  %s4644_s5 = inlined_call_operand.vmem [shape: f32[1,64], index: 5, kind: input, shape index: {}]   ;;  %s4645_s7 = inlined_call_operand.vmem [shape: f32[64,64], index: 7, kind: input, shape index: {}]   ;;  %s4646_s8 = inlined_call_operand.vmem [shape: f32[32,32], index: 8, kind: input, shape index: {}]   ;;  %s4647_s9 = inlined_call_operand.vmem [shape: f32[1,32], index: 9, kind: input, shape index: {}]   ;;  %s4648_s10 = inlined_call_operand.vmem [shape: f32[2,64,32], index: 10, kind: output, shape index: {}]  }
   0x1   :  { %v260_v0 = vld [vmem:[%s4638_s4] sm:$0xff]  ;;  %v261_v1 = vld [vmem:[%s4638_s4 + $0x8] sm:$0xff]  ;;  %v262_v2 = vld [vmem:[%s4638_s4 + $0x10] sm:$0xff]  ;;  %vm754_vm5 = vcmask 130048   ;;  %vm1735_vm6 = vcmask 523264   ;;  %vm1686_vm7 = vcmask 392192  }
   0x2   :  { %v2679_v3 = vpack.c.bf16 %v261_v1, %v260_v0  ;;  %v263_v4 = vld [vmem:[%s4638_s4 + $0x18] sm:$0xff]  ;;  %v264_v6 = vld [vmem:[%s4638_s4 + $0x20] sm:$0xff]  ;;  %v265_v7 = vld [vmem:[%s4638_s4 + $0x28] sm:$0xff] }
   0x3   :  { %v2683_v5 = vpack.c.bf16 %v263_v4, %v262_v2  ;;  %v2687_v8 = vpack.c.bf16 %v265_v7, %v264_v6  ;;  %v256_v9 = vld [vmem:[%s4639_s1] sm:$0xff]  ;;  %v266_v10 = vld [vmem:[%s4638_s4 + $0x30] sm:$0xff]  ;;  %v267_v11 = vld [vmem:[%s4638_s4 + $0x38] sm:$0xff] }
   0x4   :  { %2680 = vmatprep.subr.bf16.mxu1 %v2679_v3  ;;  %2521 = vmatprep.mubr.f32.mxu1 %v256_v9  ;;  %v51_v12 = vld [vmem:[%s4640_s2] sm:$0xff]  ;;  %v52_v13 = vld [vmem:[%s4640_s2 + $0x8] sm:$0xff]  ;;  %v53_v14 = vld [vmem:[%s4640_s2 + $0x10] sm:$0xff]  ;;  %v2691_v19 = vpack.c.bf16 %v267_v11, %v266_v10 }
   0x5   :  { %2682 = vmatpush3.bf16.msra.mxu1 %v2679_v3  ;;  %v54_v15 = vld [vmem:[%s4640_s2 + $0x18] sm:$0xff]  ;;  %v2671_v16 = vpack.c.bf16 %v52_v13, %v51_v12  ;;  %v35_v18 = vld [vmem:[%s4641_s0] sm:$0xff]  ;;  %v269_v21 = vld [vmem:[%s4638_s4 + $0x48] sm:$0xff] }
   0x6   :  { %2684 = vmatprep.subr.bf16.mxu1 %v2683_v5  ;;  %v2675_v17 = vpack.c.bf16 %v54_v15, %v53_v14  ;;  %2465 = vmatprep.mubr.msk.f32.mxu0 %vm62_vm0, %v35_v18  ;;  %v268_v20 = vld [vmem:[%s4638_s4 + $0x40] sm:$0xff]  ;;  %v3214_v22 = vld [vmem:[%s4642_s6 + $0x8] sm:$0xff]  ;;  %v270_v25 = vld [vmem:[%s4638_s4 + $0x50] sm:$0xff] }
   0x7   :  { %2672 = vmatprep.subr.bf16.mxu0 %v2671_v16  ;;  %v3219_v23 = vld [vmem:[%s4642_s6] sm:$0xff]  ;;  %v2695_v24 = vpack.c.bf16 %v269_v21, %v268_v20  ;;  %402 = vrot.lane.b32.xlu1 %v3214_v22, %s3103_s28  ;;  %v271_v26 = vld [vmem:[%s4638_s4 + $0x58] sm:$0xff]  ;;  %v36_v28 = vld [vmem:[%s4641_s0 + $0x8] sm:$0xff] }
   0x8   :  { %2674 = vmatpush3.bf16.msra.mxu0 %v2671_v16  ;;  %400 = vrot.lane.b32.xlu0 %v3219_v23, %s3103_s28  ;;  %v3234_v27 = vld [vmem:[%s4642_s6 + $0x18] sm:$0xff]  ;;  %v3242_v29 = vld [vmem:[%s4642_s6 + $0x10] sm:$0xff]  ;;  %v2699_v31 = vpack.c.bf16 %v271_v26, %v270_v25  ;;  %v272_v32 = vld [vmem:[%s4638_s4 + $0x60] sm:$0xff] }
   0x9   :  { %2686 = vmatpush3.bf16.msra.mxu1 %v2683_v5  ;;  %2676 = vmatprep.subr.bf16.mxu0 %v2675_v17  ;;  %v37_v30 = vld [vmem:[%s4641_s0 + $0x10] sm:$0xff]  ;;  %v273_v33 = vld [vmem:[%s4638_s4 + $0x68] sm:$0xff]  ;;  %v38_v35 = vld [vmem:[%s4641_s0 + $0x18] sm:$0xff] }
   0xa   :  { %2688 = vmatprep.subr.bf16.mxu1 %v2687_v8  ;;  %v3261_v34 = vld [vmem:[%s4642_s6 + $0x28] sm:$0xff]  ;;  %v3270_v36 = vld [vmem:[%s4642_s6 + $0x20] sm:$0xff]  ;;  %v2703_v38 = vpack.c.bf16 %v273_v33, %v272_v32  ;;  %v274_v39 = vld [vmem:[%s4638_s4 + $0x70] sm:$0xff] }
   0xb   :  { %406 = vrot.lane.b32.xlu1 %v3234_v27, %s3103_s28  ;;  %v39_v37 = vld [vmem:[%s4641_s0 + $0x20] sm:$0xff]  ;;  %v275_v40 = vld [vmem:[%s4638_s4 + $0x78] sm:$0xff]  ;;  %v40_v42 = vld [vmem:[%s4641_s0 + $0x28] sm:$0xff] }
   0xc   :  { %2678 = vmatpush3.bf16.msra.mxu0 %v2675_v17  ;;  %404 = vrot.lane.b32.xlu0 %v3242_v29, %s3103_s28  ;;  %v3289_v41 = vld [vmem:[%s4642_s6 + $0x38] sm:$0xff]  ;;  %v3298_v43 = vld [vmem:[%s4642_s6 + $0x30] sm:$0xff]  ;;  %v2707_v45 = vpack.c.bf16 %v275_v40, %v274_v39  ;;  %v43_v47 = vld [vmem:[%s4641_s0 + $0x40] sm:$0xff] }
   0xd   :  { %2690 = vmatpush3.bf16.msra.mxu1 %v2687_v8  ;;  %v41_v44 = vld [vmem:[%s4641_s0 + $0x30] sm:$0xff]  ;;  %v42_v46 = vld [vmem:[%s4641_s0 + $0x38] sm:$0xff]  ;;  %v44_v48 = vld [vmem:[%s4641_s0 + $0x48] sm:$0xff] }
   0xe   :  { %2692 = vmatprep.subr.bf16.mxu1 %v2691_v19  ;;  %v257_v49 = vld [vmem:[%s4639_s1 + $0x8] sm:$0xff]  ;;  %v45_v50 = vld [vmem:[%s4641_s0 + $0x50] sm:$0xff]  ;;  %v46_v52 = vld [vmem:[%s4641_s0 + $0x58] sm:$0xff] }
   0xf   :  { %2466 = vmatmul.mubr.msk.f32.vlgmr.msra.gmra.mrb[0].mxu0 %vm62_vm0, %v36_v28  ;;  %410 = vrot.lane.b32.xlu1 %v3261_v34, %s3103_s28  ;;  %v258_v51 = vld [vmem:[%s4639_s1 + $0x10] sm:$0xff]  ;;  %v259_v53 = vld [vmem:[%s4639_s1 + $0x18] sm:$0xff]  ;;  %v47_v54 = vld [vmem:[%s4641_s0 + $0x60] sm:$0xff] }
  0x10   :  { %2468 = vmatprep.mubr.msk.f32.mxu0 %vm62_vm0, %v37_v30  ;;  %408 = vrot.lane.b32.xlu0 %v3270_v36, %s3103_s28  ;;  %v48_v55 = vld [vmem:[%s4641_s0 + $0x68] sm:$0xff]  ;;  %v49_v56 = vld [vmem:[%s4641_s0 + $0x70] sm:$0xff]  ;;  %v50_v57 = vld [vmem:[%s4641_s0 + $0x78] sm:$0xff] }
  0x11   :  { %2694 = vmatpush3.bf16.msra.mxu1 %v2691_v19  ;;  %v3359_v59 = vld [vmem:[%s4643_s3] ss:$0 sm:$0xff]  ;;  %vm3417_vm1 = vmpackc.low %vm62_vm0, %vm62_vm0 }
  0x12   :  { %2696 = vmatprep.subr.bf16.mxu1 %v2695_v24  ;;  %v2267_v11 = vld [vmem:[%s4644_s5] ss:$0 sm:$0xff]  ;;  %s3104_s5 = smov 96  }
  0x13   :  { %2469 = vmatmul.mubr.msk.f32.gmra.mrb[2].mxu0 %vm62_vm0, %v38_v35  ;;  %414 = vrot.lane.b32.xlu1 %v3289_v41, %s3103_s28 }
  0x14   :  { %2471 = vmatprep.mubr.msk.f32.mxu0 %vm62_vm0, %v39_v37  ;;  %412 = vrot.lane.b32.xlu0 %v3298_v43, %s3103_s28 }
  0x15   :  { %2698 = vmatpush3.bf16.msra.mxu1 %v2695_v24 }
  0x16   :  { %2700 = vmatprep.subr.bf16.mxu1 %v2699_v31 }
  0x17   :  { %2472 = vmatmul.mubr.msk.f32.gmra.mrb[4].mxu0 %vm62_vm0, %v40_v42 }
  0x18   :  { %2474 = vmatprep.mubr.msk.f32.mxu0 %vm62_vm0, %v41_v44 }
  0x19   :  { %2702 = vmatpush3.bf16.msra.mxu1 %v2699_v31 }
  0x1a   :  { %2704 = vmatprep.subr.bf16.mxu1 %v2703_v38 }
  0x1b   :  { %2475 = vmatmul.mubr.msk.f32.gmra.mrb[6].mxu0 %vm62_vm0, %v42_v46 }
  0x1c   :  { %2477 = vmatprep.mubr.msk.f32.mxu0 %vm62_vm0, %v43_v47 }
  0x1d   :  { %2706 = vmatpush3.bf16.msra.mxu1 %v2703_v38 }
  0x1e   :  { %2708 = vmatprep.subr.bf16.mxu1 %v2707_v45 }
  0x1f   :  { %2478 = vmatmul.mubr.msk.f32.gmra.mrb[8].mxu0 %vm62_vm0, %v44_v48 }
  0x20   :  { %2480 = vmatprep.mubr.msk.f32.mxu0 %vm62_vm0, %v45_v50 }
  0x21   :  { %2710 = vmatpush3.bf16.msra.mxu1 %v2707_v45 }
  0x23   :  { %2481 = vmatmul.mubr.msk.f32.gmra.mrb[10].mxu0 %vm62_vm0, %v46_v52 }
  0x24   :  { %2522 = vmatmul.mubr.f32.vlgmr.msra.gmra.mrb[0].mxu1 %v257_v49  ;;  %2483 = vmatprep.mubr.msk.f32.mxu0 %vm62_vm0, %v47_v54 }
  0x25   :  { %2524 = vmatprep.mubr.f32.mxu1 %v258_v51 }
  0x27   :  { %2484 = vmatmul.mubr.msk.f32.gmra.mrb[12].mxu0 %vm62_vm0, %v48_v55 }
  0x28   :  { %2525 = vmatmul.mubr.f32.gmra.mrb[2].mxu1 %v259_v53  ;;  %2486 = vmatprep.mubr.msk.f32.mxu0 %vm62_vm0, %v49_v56 }
  0x2b   :  { %2487 = vmatmul.mubr.msk.f32.gmra.mrb[14].mxu0 %vm62_vm0, %v50_v57 }
  0x79   :  { %v3354_v58 = vpop.permute.xlu1 %402 }
  0x7a   :  { %v3361_v60 = vpop.permute.xlu0 %400 }
  0x7d   :  { %v3366_v0 = vpop.permute.xlu1 %406 }
  0x7e   :  { %v3373_v3 = vpop.permute.xlu0 %404 }
  0x81   :  { %v3379_v6 = vpop.permute.xlu1 %410 }
  0x82   :  { %v3381_v7 = vpop.permute.xlu0 %408 }
  0x85   :  { %v3391_v12 = vpop.permute.xlu1 %414 }
  0x86   :  { %v3395_v18 = vpop.permute.xlu0 %412 }
  0xe2   :  { %v3363_v61 = vpop.f32.mrb[0].mxu0 }
  0xe3   :  { %v177_v62 = vpop.f32.mrb[1].mxu0 }
  0xe4   :  { %v178_v63 = vadd.f32 %v3359_v59, %v177_v62 }
  0xe6   :  { %2543 = vmatprep.mubr.msk.f32.mxu0 %vm62_vm0, %v178_v63  ;;  %v3369_v1 = vpop.f32.mrb[2].mxu0 }
  0xe7   :  { %v3371_v2 = vpop.f32.mrb[3].mxu0 }
  0xea   :  { %v3375_v4 = vpop.f32.mrb[4].mxu0 }
  0xeb   :  { %v3377_v5 = vpop.f32.mrb[5].mxu0 }
  0xee   :  { %v2476_v8 = vpop.f32.mrb[6].mxu0 }
  0xef   :  { %v3384_v9 = vadd.f32 %v2476_v8, %v3359_v59  ;;  %v3386_v10 = vpop.f32.mrb[7].mxu0 }
  0xf2   :  { %v3393_v13 = vpop.f32.mrb[8].mxu0 }
  0xf3   :  { %v217_v15 = vpop.f32.mrb[9].mxu0 }
  0xf4   :  { %v218_v19 = vadd.f32 %v3359_v59, %v217_v15 }
  0xf6   :  { %2571 = vmatprep.mubr.msk.f32.mxu1 %vm62_vm0, %v218_v19  ;;  %v3403_v28 = vpop.f32.mrb[10].mxu0 }
  0xf7   :  { %v2523_v14 = vpop.f32.mrb[0].mxu1  ;;  %v3409_v37 = vpop.f32.mrb[11].mxu0 }
  0xf8   :  { %v355_v16 = vadd.f32 %v2523_v14, %v2267_v11  ;;  %v349_v17 = vpop.f32.mrb[1].mxu1 }
  0xf9   :  { %v350_v20 = vadd.f32 %v2267_v11, %v349_v17 }
  0xfa   :  { %v431_v21 = vmul.f32 %v3391_v12, %v355_v16  ;;  %v427_v24 = vmul.f32 %v3366_v0, %v355_v16  ;;  %v425_v25 = vmul.f32 %v3354_v58, %v355_v16  ;;  %v377_v26 = vmul.f32 %v3214_v22, %v355_v16  ;;  %v2485_v54 = vpop.f32.mrb[12].mxu0 }
  0xfb   :  { %v430_v30 = vmul.f32 %v3395_v18, %v350_v20  ;;  %v426_v31 = vmul.f32 %v3373_v3, %v350_v20  ;;  %v424_v32 = vmul.f32 %v3361_v60, %v350_v20  ;;  %v376_v33 = vmul.f32 %v3219_v23, %v350_v20  ;;  %v2526_v35 = vpop.f32.mrb[2].mxu1  ;;  %v3426_v62 = vpop.f32.mrb[13].mxu0 }
  0xfc   :  { %v378_v38 = vmul.f32 %v3242_v29, %v350_v20  ;;  %v379_v39 = vmul.f32 %v3234_v27, %v355_v16  ;;  %v428_v40 = vmul.f32 %v3381_v7, %v350_v20  ;;  %v429_v42 = vmul.f32 %v3379_v6, %v355_v16  ;;  %v359_v44 = vpop.f32.mrb[3].mxu1 }
  0xfd   :  { %v2812_v45 = vpack.i.bf16 %v427_v24, %v426_v31  ;;  %v2807_v46 = vpack.i.bf16 %v425_v25, %v424_v32  ;;  %v2711_v47 = vpack.c.bf16 %v377_v26, %v376_v33  ;;  %v2822_v49 = vpack.i.bf16 %v431_v21, %v430_v30 }
  0xfe   :  { %v2717_v50 = vpack.c.bf16 %v379_v39, %v378_v38  ;;  %v2817_v51 = vpack.i.bf16 %v429_v42, %v428_v40  ;;  %v365_v52 = vadd.f32 %v2526_v35, %v2267_v11  ;;  %v360_v53 = vadd.f32 %v2267_v11, %v359_v44 }
  0xff   :  { %2813 = vrot.lane.b32.xlu0 %v2812_v45, %s3104_s5  ;;  %2808 = vrot.lane.b32.xlu1 %v2807_v46, %s3104_s5  ;;  %v380_v55 = vmul.f32 %v3270_v36, %v350_v20  ;;  %v381_v56 = vmul.f32 %v3261_v34, %v355_v16  ;;  %v382_v57 = vmul.f32 %v3298_v43, %v350_v20 }
 0x100   :  { %2713 = vmatprep.subr.msk.bf16.mxu0 %vm3417_vm1, %v2711_v47  ;;  %v384_v63 = vmul.f32 %v3219_v23, %v360_v53  ;;  %v385_v8 = vmul.f32 %v3214_v22, %v365_v52  ;;  %v383_v11 = vmul.f32 %v3289_v41, %v355_v16  ;;  %v386_v14 = vmul.f32 %v3242_v29, %v360_v53 }
 0x101   :  { %2716 = vmatpush3.bf16.xpose.msk.msra.mxu0 %vm3417_vm1, %v2711_v47  ;;  %v2723_v15 = vpack.c.bf16 %v381_v56, %v380_v55  ;;  %v387_v17 = vmul.f32 %v3234_v27, %v365_v52  ;;  %v388_v19 = vmul.f32 %v3270_v36, %v360_v53  ;;  %v389_v20 = vmul.f32 %v3261_v34, %v365_v52  ;;  %v2488_v36 = vpop.f32.mrb[14].mxu0 }
 0x102   :  { %2719 = vmatprep.subr.msk.bf16.mxu0 %vm3417_vm1, %v2717_v50  ;;  %v2735_v23 = vpack.c.bf16 %v385_v8, %v384_v63  ;;  %v2729_v21 = vpack.c.bf16 %v383_v11, %v382_v57  ;;  %v390_v22 = vmul.f32 %v3298_v43, %v360_v53  ;;  %v391_v16 = vmul.f32 %v3289_v41, %v365_v52  ;;  %v247_v26 = vpop.f32.mrb[15].mxu0  ;;  %v441_v57 = vld [vmem:[%s4645_s7 + $0x8] sm:$0xff]  ;;  %v440_v63 = vld [vmem:[%s4645_s7] sm:$0xff] }
 0x103   :  { %2823 = vrot.lane.b32.xlu0 %v2822_v49, %s3104_s5  ;;  %2818 = vrot.lane.b32.xlu1 %v2817_v51, %s3104_s5  ;;  %v2741_v29 = vpack.c.bf16 %v387_v17, %v386_v14  ;;  %v2747_v24 = vpack.c.bf16 %v389_v20, %v388_v19  ;;  %v432_v27 = vmul.f32 %v3361_v60, %v360_v53 }
 0x104   :  { %2737 = vmatprep.subr.msk.bf16.mxu1 %vm3417_vm1, %v2735_v23  ;;  %v2753_v34 = vpack.c.bf16 %v391_v16, %v390_v22  ;;  %v433_v25 = vmul.f32 %v3354_v58, %v365_v52  ;;  %v243_v41 = vadd.f32 %v2485_v54, %v3359_v59  ;;  %v253_v43 = vadd.f32 %v2488_v36, %v3359_v59 }
 0x105   :  { %2740 = vmatpush3.bf16.xpose.msk.msra.mxu1 %vm3417_vm1, %v2735_v23  ;;  %v248_v30 = vadd.f32 %v3359_v59, %v247_v26  ;;  %v3457_v31 = vmul.f32 %v3381_v7, %v360_v53  ;;  %v3460_v32 = vmul.f32 %v3379_v6, %v365_v52  ;;  %v3463_v58 = vmul.f32 %v3395_v18, %v360_v53 }
 0x106   :  { %2743 = vmatprep.subr.msk.bf16.mxu1 %vm3417_vm1, %v2741_v29  ;;  %v2827_v60 = vpack.i.bf16 %v433_v25, %v432_v27  ;;  %v3466_v33 = vmul.f32 %v3391_v12, %v365_v52  ;;  %v3469_v35 = vmul.f32 %v3373_v3, %v360_v53  ;;  %v3472_v38 = vmul.f32 %v3366_v0, %v365_v52  ;;  %v3569_v25 = vld [vmem:[%s4645_s7 + $0x10] sm:$0xff] }
 0x107   :  { %v188_v0 = vadd.f32 %v3359_v59, %v3371_v2  ;;  %v183_v3 = vadd.f32 %v3363_v61, %v3359_v59  ;;  %v193_v18 = vadd.f32 %v3369_v1, %v3359_v59  ;;  %v223_v39 = vadd.f32 %v3393_v13, %v3359_v59 }
 0x108   :  { %2828 = vrot.lane.b32.xlu1 %v2827_v60, %s3104_s5  ;;  %v198_v40 = vadd.f32 %v3359_v59, %v3377_v5  ;;  %v228_v42 = vadd.f32 %v3359_v59, %v3409_v37  ;;  %v203_v61 = vadd.f32 %v3375_v4, %v3359_v59  ;;  %v233_v1 = vadd.f32 %v3403_v28, %v3359_v59 }
 0x109   :  { %2722 = vmatpush3.bf16.xpose.msk.msra.mxu0 %vm3417_vm1, %v2717_v50  ;;  %v208_v2 = vadd.f32 %v3359_v59, %v3386_v10  ;;  %v238_v5 = vadd.f32 %v3359_v59, %v3426_v62 }
 0x10a   :  { %2725 = vmatprep.subr.msk.bf16.mxu0 %vm3417_vm1, %v2723_v15 }
 0x10d   :  { %2746 = vmatpush3.bf16.xpose.msk.msra.mxu1 %vm3417_vm1, %v2741_v29 }
 0x10e   :  { %2749 = vmatprep.subr.msk.bf16.mxu1 %vm3417_vm1, %v2747_v24 }
 0x111   :  { %2728 = vmatpush3.bf16.xpose.msk.msra.mxu0 %vm3417_vm1, %v2723_v15 }
 0x112   :  { %2731 = vmatprep.subr.msk.bf16.mxu0 %vm3417_vm1, %v2729_v21 }
 0x115   :  { %2752 = vmatpush3.bf16.xpose.msk.msra.mxu1 %vm3417_vm1, %v2747_v24 }
 0x116   :  { %2755 = vmatprep.subr.msk.bf16.mxu1 %vm3417_vm1, %v2753_v34 }
 0x119   :  { %2734 = vmatpush3.bf16.xpose.msk.msra.mxu0 %vm3417_vm1, %v2729_v21 }
 0x11d   :  { %2758 = vmatpush3.bf16.xpose.msk.msra.mxu1 %vm3417_vm1, %v2753_v34  ;;  %v3564_v34 = vld [vmem:[%s4645_s7 + $0x18] sm:$0xff] }
 0x120   :  { %2544 = vmatmul.mubr.msk.f32.vlgmr.msra.gmra.mrb[16].mxu0 %vm62_vm0, %v183_v3 }
 0x121   :  { %2546 = vmatprep.mubr.msk.f32.mxu0 %vm62_vm0, %v188_v0 }
 0x124   :  { %2547 = vmatmul.mubr.msk.f32.gmra.mrb[18].mxu0 %vm62_vm0, %v193_v18  ;;  %2572 = vmatmul.mubr.msk.f32.vlgmr.msra.gmra.mrb[4].mxu1 %vm62_vm0, %v223_v39 }
 0x125   :  { %2549 = vmatprep.mubr.msk.f32.mxu0 %vm62_vm0, %v198_v40  ;;  %2574 = vmatprep.mubr.msk.f32.mxu1 %vm62_vm0, %v228_v42 }
 0x128   :  { %2550 = vmatmul.mubr.msk.f32.gmra.mrb[20].mxu0 %vm62_vm0, %v203_v61  ;;  %2575 = vmatmul.mubr.msk.f32.gmra.mrb[6].mxu1 %vm62_vm0, %v233_v1 }
 0x129   :  { %2552 = vmatprep.mubr.msk.f32.mxu0 %vm62_vm0, %v208_v2  ;;  %2577 = vmatprep.mubr.msk.f32.mxu1 %vm62_vm0, %v238_v5 }
 0x12c   :  { %2553 = vmatmul.mubr.msk.f32.gmra.mrb[22].mxu0 %vm62_vm0, %v3384_v9  ;;  %2578 = vmatmul.mubr.msk.f32.gmra.mrb[8].mxu1 %vm62_vm0, %v243_v41 }
 0x12d   :  { %2580 = vmatprep.mubr.msk.f32.mxu1 %vm62_vm0, %v248_v30 }
 0x130   :  { %2581 = vmatmul.mubr.msk.f32.gmra.mrb[10].mxu1 %vm62_vm0, %v253_v43 }
 0x171   :  { %v2814_v4 = vpop.permute.xlu0 %2813  ;;  %v2809_v10 = vpop.permute.xlu1 %2808 }
 0x172   :  { %v2816_v59 = vunpack.i.h.bf16 %v2814_v4  ;;  %v2815_v13 = vunpack.i.l.bf16 %v2814_v4  ;;  %v2811_v28 = vunpack.i.h.bf16 %v2809_v10  ;;  %v2810_v37 = vunpack.i.l.bf16 %v2809_v10 }
 0x174   :  { %v2759_v44 = vpack.c.bf16 %v2811_v28, %v2810_v37  ;;  %v2763_v48 = vpack.c.bf16 %v2816_v59, %v2815_v13 }
 0x175   :  { %v2819_v45 = vpop.permute.xlu1 %2818  ;;  %v2824_v49 = vpop.permute.xlu0 %2823 }
 0x176   :  { %v2821_v46 = vunpack.i.h.bf16 %v2819_v45  ;;  %v2820_v47 = vunpack.i.l.bf16 %v2819_v45  ;;  %2760 = vmatprep.subr.bf16.mxu0 %v2759_v44  ;;  %v2826_v9 = vunpack.i.h.bf16 %v2824_v49  ;;  %v2825_v50 = vunpack.i.l.bf16 %v2824_v49 }
 0x177   :  { %2762 = vmatpush3.bf16.msra.mxu0 %v2759_v44 }
 0x178   :  { %2764 = vmatprep.subr.bf16.mxu0 %v2763_v48  ;;  %v2767_v51 = vpack.c.bf16 %v2821_v46, %v2820_v47  ;;  %v2771_v55 = vpack.c.bf16 %v2826_v9, %v2825_v50  ;;  %v445_v50 = vld [vmem:[%s4645_s7 + $0x28] sm:$0xff] }
 0x17a   :  { %v2829_v52 = vpop.permute.xlu1 %2828 }
 0x17b   :  { %2766 = vmatpush3.bf16.msra.mxu0 %v2763_v48  ;;  %v2831_v53 = vunpack.i.h.bf16 %v2829_v52  ;;  %v2830_v54 = vunpack.i.l.bf16 %v2829_v52 }
 0x17c   :  { %2768 = vmatprep.subr.bf16.mxu0 %v2767_v51 }
 0x17d   :  { %v3536_v56 = vpack.c.bf16 %v2831_v53, %v2830_v54 }
 0x17f   :  { %2770 = vmatpush3.bf16.msra.mxu0 %v2767_v51  ;;  %v444_v51 = vld [vmem:[%s4645_s7 + $0x20] sm:$0xff] }
 0x180   :  { %2772 = vmatprep.subr.bf16.mxu0 %v2771_v55 }
 0x183   :  { %2774 = vmatpush3.bf16.msra.mxu0 %v2771_v55 }
 0x184   :  { %2776 = vmatprep.subr.bf16.mxu0 %v3536_v56 }
 0x1f3   :  { %v2545_v62 = vpop.f32.mrb[16].mxu0 }
 0x1f4   :  { %v3545_v8 = vadd.f32 %v2545_v62, %v441_v57  ;;  %v562_v11 = vpop.f32.mrb[17].mxu0 }
 0x1f5   :  { %v3547_v14 = vadd.f32 %v562_v11, %v440_v63 }
 0x1f6   :  { %v1176_v15 = vsel %vm1172_vm2, %v3545_v8, -inf  ;;  %v935_v17 = vsel %vm931_vm3, %v3545_v8, -inf  ;;  %v1417_v22 = vsel %vm1413_vm4, %v3545_v8, -inf  ;;  %v758_v26 = vsel %vm754_vm5, %v3545_v8, -inf }
 0x1f7   :  { %1177 = vmax.xlane.f32.xlu1 %v1176_v15  ;;  %936 = vmax.xlane.f32.xlu0 %v935_v17  ;;  %v2548_v19 = vpop.f32.mrb[18].mxu0  ;;  %v2573_v20 = vpop.f32.mrb[4].mxu1  ;;  %v932_v16 = vsel %vm931_vm3, %v3547_v14, -inf  ;;  %v1414_v41 = vsel %vm1413_vm4, %v3547_v14, -inf  ;;  %v1173_v39 = vsel %vm1172_vm2, %v3547_v14, -inf  ;;  %v755_v40 = vsel %vm754_vm5, %v3547_v14, -inf }
 0x1f8   :  { %v572_v23 = vpop.f32.mrb[19].mxu0  ;;  %v715_v21 = vpop.f32.mrb[5].mxu1  ;;  %v3580_v60 = vadd.f32 %v2548_v19, %v3564_v34  ;;  %v3605_v10 = vadd.f32 %v2573_v20, %v441_v57 }
 0x1f9   :  { %v3583_v0 = vadd.f32 %v572_v23, %v3569_v25  ;;  %v3607_v59 = vadd.f32 %v715_v21, %v440_v63 }
 0x1fa   :  { %v941_v61 = vsel %vm931_vm3, %v3580_v60, -inf  ;;  %v1182_v5 = vsel %vm1172_vm2, %v3580_v60, -inf  ;;  %v1423_v13 = vsel %vm1413_vm4, %v3580_v60, -inf  ;;  %v959_v37 = vsel %vm931_vm3, %v3605_v10, -inf }
 0x1fb   :  { %1418 = vmax.xlane.f32.xlu1 %v1417_v22  ;;  %933 = vmax.xlane.f32.xlu0 %v932_v16  ;;  %v2551_v29 = vpop.f32.mrb[20].mxu0  ;;  %v3557_v24 = vpop.f32.mrb[6].mxu1  ;;  %v938_v1 = vsel %vm931_vm3, %v3583_v0, -inf  ;;  %v1179_v4 = vsel %vm1172_vm2, %v3583_v0, -inf  ;;  %v1420_v28 = vsel %vm1413_vm4, %v3583_v0, -inf  ;;  %v956_v44 = vsel %vm931_vm3, %v3607_v59, -inf }
 0x1fc   :  { %v582_v27 = vpop.f32.mrb[21].mxu0  ;;  %v3559_v36 = vpop.f32.mrb[7].mxu1  ;;  %v1200_v45 = vsel %vm1172_vm2, %v3605_v10, -inf  ;;  %v1197_v46 = vsel %vm1172_vm2, %v3607_v59, -inf  ;;  %v1441_v47 = vsel %vm1413_vm4, %v3605_v10, -inf  ;;  %v1438_v48 = vsel %vm1413_vm4, %v3607_v59, -inf }
 0x1fd   :  { %v764_v49 = vsel %vm754_vm5, %v3580_v60, -inf  ;;  %v761_v9 = vsel %vm754_vm5, %v3583_v0, -inf  ;;  %v3635_v52 = vadd.f32 %v2551_v29, %v445_v50  ;;  %v3637_v53 = vadd.f32 %v582_v27, %v444_v51 }
 0x1fe   :  { %v782_v54 = vsel %vm754_vm5, %v3605_v10, -inf  ;;  %v779_v55 = vsel %vm754_vm5, %v3607_v59, -inf  ;;  %v3653_v15 = vadd.f32 %v3557_v24, %v3564_v34  ;;  %v3657_v17 = vadd.f32 %v3559_v36, %v3569_v25  ;;  %v447_v34 = vld [vmem:[%s4645_s7 + $0x38] sm:$0xff]  ;;  %v446_v25 = vld [vmem:[%s4645_s7 + $0x30] sm:$0xff]  ;;  %s3105_s7 = smov 112  }
 0x1ff   :  { %759 = vmax.xlane.f32.xlu1 %v758_v26  ;;  %1415 = vmax.xlane.f32.xlu0 %v1414_v41  ;;  %v3575_v43 = vpop.f32.mrb[22].mxu0  ;;  %v3577_v30 = vpop.f32.mrb[8].mxu1  ;;  %v947_v57 = vsel %vm931_vm3, %v3635_v52, -inf  ;;  %v944_v62 = vsel %vm931_vm3, %v3637_v53, -inf  ;;  %v1188_v63 = vsel %vm1172_vm2, %v3635_v52, -inf  ;;  %v1185_v11 = vsel %vm1172_vm2, %v3637_v53, -inf }
 0x200   :  { %v3585_v3 = vpop.f32.mrb[23].mxu0  ;;  %v3587_v18 = vpop.f32.mrb[9].mxu1  ;;  %v1429_v19 = vsel %vm1413_vm4, %v3635_v52, -inf  ;;  %v1426_v20 = vsel %vm1413_vm4, %v3637_v53, -inf  ;;  %v965_v23 = vsel %vm931_vm3, %v3653_v15, -inf  ;;  %v962_v21 = vsel %vm931_vm3, %v3657_v17, -inf }
 0x201   :  { %v1206_v22 = vsel %vm1172_vm2, %v3653_v15, -inf  ;;  %v1203_v16 = vsel %vm1172_vm2, %v3657_v17, -inf  ;;  %v1447_v29 = vsel %vm1413_vm4, %v3653_v15, -inf  ;;  %v1444_v24 = vsel %vm1413_vm4, %v3657_v17, -inf }
 0x202   :  { %v770_v27 = vsel %vm754_vm5, %v3635_v52, -inf  ;;  %v767_v36 = vsel %vm754_vm5, %v3637_v53, -inf  ;;  %v3686_v26 = vadd.f32 %v3575_v43, %v447_v34  ;;  %v3689_v41 = vadd.f32 %v3585_v3, %v446_v25 }
 0x203   :  { %1174 = vmax.xlane.f32.xlu1 %v1173_v39  ;;  %756 = vmax.xlane.f32.xlu0 %v755_v40  ;;  %v3593_v42 = vpop.f32.mrb[10].mxu1  ;;  %v788_v39 = vsel %vm754_vm5, %v3653_v15, -inf  ;;  %v785_v40 = vsel %vm754_vm5, %v3657_v17, -inf }
 0x204   :  { %v3599_v2 = vpop.f32.mrb[11].mxu1  ;;  %v1194_v43 = vsel %vm1172_vm2, %v3686_v26, -inf  ;;  %v1191_v3 = vsel %vm1172_vm2, %v3689_v41, -inf }
 0x207   :  { %942 = vmax.xlane.f32.xlu1 %v941_v61  ;;  %939 = vmax.xlane.f32.xlu0 %v938_v1  ;;  %v953_v61 = vsel %vm931_vm3, %v3686_v26, -inf  ;;  %v950_v1 = vsel %vm931_vm3, %v3689_v41, -inf }
 0x20b   :  { %1183 = vmax.xlane.f32.xlu1 %v1182_v5  ;;  %1180 = vmax.xlane.f32.xlu0 %v1179_v4  ;;  %v3704_v5 = vadd.f32 %v3577_v30, %v445_v50  ;;  %v3707_v4 = vadd.f32 %v3587_v18, %v444_v51 }
 0x20d   :  { %v1212_v30 = vsel %vm1172_vm2, %v3704_v5, -inf  ;;  %v1209_v18 = vsel %vm1172_vm2, %v3707_v4, -inf  ;;  %v794_v50 = vsel %vm754_vm5, %v3704_v5, -inf  ;;  %v791_v51 = vsel %vm754_vm5, %v3707_v4, -inf }
 0x20f   :  { %1424 = vmax.xlane.f32.xlu1 %v1423_v13  ;;  %1421 = vmax.xlane.f32.xlu0 %v1420_v28  ;;  %v1435_v13 = vsel %vm1413_vm4, %v3686_v26, -inf  ;;  %v1432_v28 = vsel %vm1413_vm4, %v3689_v41, -inf }
 0x213   :  { %960 = vmax.xlane.f32.xlu1 %v959_v37  ;;  %957 = vmax.xlane.f32.xlu0 %v956_v44  ;;  %v971_v37 = vsel %vm931_vm3, %v3704_v5, -inf  ;;  %v968_v44 = vsel %vm931_vm3, %v3707_v4, -inf }
 0x217   :  { %1201 = vmax.xlane.f32.xlu1 %v1200_v45  ;;  %1198 = vmax.xlane.f32.xlu0 %v1197_v46  ;;  %v1453_v45 = vsel %vm1413_vm4, %v3704_v5, -inf  ;;  %v1450_v46 = vsel %vm1413_vm4, %v3707_v4, -inf }
 0x21b   :  { %1442 = vmax.xlane.f32.xlu1 %v1441_v47  ;;  %1439 = vmax.xlane.f32.xlu0 %v1438_v48  ;;  %v776_v47 = vsel %vm754_vm5, %v3686_v26, -inf  ;;  %v773_v48 = vsel %vm754_vm5, %v3689_v41, -inf }
 0x21f   :  { %765 = vmax.xlane.f32.xlu1 %v764_v49  ;;  %762 = vmax.xlane.f32.xlu0 %v761_v9  ;;  %v3730_v49 = vadd.f32 %v3593_v42, %v447_v34  ;;  %v3733_v9 = vadd.f32 %v3599_v2, %v446_v25 }
 0x221   :  { %v1218_v42 = vsel %vm1172_vm2, %v3730_v49, -inf  ;;  %v1215_v2 = vsel %vm1172_vm2, %v3733_v9, -inf }
 0x223   :  { %783 = vmax.xlane.f32.xlu1 %v782_v54  ;;  %780 = vmax.xlane.f32.xlu0 %v779_v55  ;;  %v977_v54 = vsel %vm931_vm3, %v3730_v49, -inf  ;;  %v974_v55 = vsel %vm931_vm3, %v3733_v9, -inf }
 0x227   :  { %948 = vmax.xlane.f32.xlu1 %v947_v57  ;;  %945 = vmax.xlane.f32.xlu0 %v944_v62  ;;  %v1459_v57 = vsel %vm1413_vm4, %v3730_v49, -inf  ;;  %v1456_v62 = vsel %vm1413_vm4, %v3733_v9, -inf }
 0x22b   :  { %1189 = vmax.xlane.f32.xlu1 %v1188_v63  ;;  %1186 = vmax.xlane.f32.xlu0 %v1185_v11  ;;  %v800_v63 = vsel %vm754_vm5, %v3730_v49, -inf  ;;  %v797_v11 = vsel %vm754_vm5, %v3733_v9, -inf }
 0x22f   :  { %1430 = vmax.xlane.f32.xlu1 %v1429_v19  ;;  %1427 = vmax.xlane.f32.xlu0 %v1426_v20 }
 0x233   :  { %966 = vmax.xlane.f32.xlu1 %v965_v23  ;;  %963 = vmax.xlane.f32.xlu0 %v962_v21 }
 0x237   :  { %1207 = vmax.xlane.f32.xlu1 %v1206_v22  ;;  %1204 = vmax.xlane.f32.xlu0 %v1203_v16 }
 0x23b   :  { %1448 = vmax.xlane.f32.xlu1 %v1447_v29  ;;  %1445 = vmax.xlane.f32.xlu0 %v1444_v24 }
 0x23f   :  { %771 = vmax.xlane.f32.xlu1 %v770_v27  ;;  %768 = vmax.xlane.f32.xlu0 %v767_v36 }
 0x243   :  { %789 = vmax.xlane.f32.xlu1 %v788_v39  ;;  %786 = vmax.xlane.f32.xlu0 %v785_v40 }
 0x247   :  { %954 = vmax.xlane.f32.xlu1 %v953_v61  ;;  %951 = vmax.xlane.f32.xlu0 %v950_v1 }
 0x24b   :  { %1195 = vmax.xlane.f32.xlu1 %v1194_v43  ;;  %1192 = vmax.xlane.f32.xlu0 %v1191_v3 }
 0x24f   :  { %1436 = vmax.xlane.f32.xlu1 %v1435_v13  ;;  %1433 = vmax.xlane.f32.xlu0 %v1432_v28 }
 0x253   :  { %972 = vmax.xlane.f32.xlu1 %v971_v37  ;;  %969 = vmax.xlane.f32.xlu0 %v968_v44 }
 0x257   :  { %1213 = vmax.xlane.f32.xlu1 %v1212_v30  ;;  %1210 = vmax.xlane.f32.xlu0 %v1209_v18 }
 0x25b   :  { %1454 = vmax.xlane.f32.xlu1 %v1453_v45  ;;  %1451 = vmax.xlane.f32.xlu0 %v1450_v46 }
 0x25f   :  { %777 = vmax.xlane.f32.xlu1 %v776_v47  ;;  %774 = vmax.xlane.f32.xlu0 %v773_v48 }
 0x263   :  { %795 = vmax.xlane.f32.xlu1 %v794_v50  ;;  %792 = vmax.xlane.f32.xlu0 %v791_v51 }
 0x267   :  { %978 = vmax.xlane.f32.xlu1 %v977_v54  ;;  %975 = vmax.xlane.f32.xlu0 %v974_v55 }
 0x26b   :  { %1219 = vmax.xlane.f32.xlu1 %v1218_v42  ;;  %1216 = vmax.xlane.f32.xlu0 %v1215_v2 }
 0x26f   :  { %1460 = vmax.xlane.f32.xlu1 %v1459_v57  ;;  %1457 = vmax.xlane.f32.xlu0 %v1456_v62 }
 0x273   :  { %801 = vmax.xlane.f32.xlu1 %v800_v63  ;;  %798 = vmax.xlane.f32.xlu0 %v797_v11 }
 0x284   :  { %v1178_v19 = vpop.xlane.xlu1 %1177  ;;  %v937_v20 = vpop.xlane.xlu0 %936 }
 0x285   :  { %v1222_v23 = vsub.f32 %v3545_v8, %v1178_v19  ;;  %v981_v21 = vsub.f32 %v3545_v8, %v937_v20 }
 0x287   :  { %v998_v22 = vmul.f32 1.442695, %v981_v21  ;;  %v1239_v24 = vmul.f32 1.442695, %v1222_v23 }
 0x288   :  { %v1419_v16 = vpop.xlane.xlu1 %1418  ;;  %v934_v29 = vpop.xlane.xlu0 %933 }
 0x289   :  { %v1463_v27 = vsub.f32 %v3545_v8, %v1419_v16  ;;  %v980_v36 = vsub.f32 %v3547_v14, %v934_v29  ;;  %2847 = vpow2.f32 %v998_v22 }
 0x28a   :  { %2849 = vpow2.f32 %v1239_v24 }
 0x28b   :  { %v996_v34 = vmul.f32 1.442695, %v980_v36  ;;  %v1480_v40 = vmul.f32 1.442695, %v1463_v27 }
 0x28c   :  { %v760_v25 = vpop.xlane.xlu1 %759  ;;  %v1416_v39 = vpop.xlane.xlu0 %1415 }
 0x28d   :  { %v1462_v61 = vsub.f32 %v3547_v14, %v1416_v39  ;;  %2851 = vpow2.f32 %v996_v34  ;;  %v804_v27 = vsub.f32 %v3545_v8, %v760_v25 }
 0x28e   :  { %2853 = vpow2.f32 %v1480_v40 }
 0x28f   :  { %v1478_v1 = vmul.f32 1.442695, %v1462_v61  ;;  %v821_v61 = vmul.f32 1.442695, %v804_v27 }
 0x290   :  { %v1175_v43 = vpop.xlane.xlu1 %1174  ;;  %v757_v3 = vpop.xlane.xlu0 %756 }
 0x291   :  { %v1221_v13 = vsub.f32 %v3547_v14, %v1175_v43  ;;  %2855 = vpow2.f32 %v1478_v1  ;;  %v803_v1 = vsub.f32 %v3547_v14, %v757_v3 }
 0x293   :  { %v1237_v28 = vmul.f32 1.442695, %v1221_v13  ;;  %v3761_v37 = vpop.eup %2847  ;;  %v819_v8 = vmul.f32 1.442695, %v803_v1 }
 0x294   :  { %v943_v44 = vpop.xlane.xlu1 %942  ;;  %v3763_v30 = vpop.xlane.xlu0 %939  ;;  %1046 = vrot.lane.b32.xlu1 %v3761_v37, %s3105_s7 }
 0x295   :  { %2857 = vpow2.f32 %v1237_v28  ;;  %v983_v18 = vsub.f32 %v3580_v60, %v943_v44  ;;  %v3768_v45 = vpop.eup %2849 }
 0x297   :  { %v1002_v46 = vmul.f32 1.442695, %v983_v18  ;;  %v3770_v47 = vpop.eup %2851 }
 0x298   :  { %v1184_v48 = vpop.xlane.xlu1 %1183  ;;  %v3772_v50 = vpop.xlane.xlu0 %1180  ;;  %1287 = vrot.lane.b32.xlu1 %v3768_v45, %s3104_s5  ;;  %1044 = vrot.lane.b32.xlu0 %v3770_v47, %s3105_s7 }
 0x299   :  { %2859 = vpow2.f32 %v1002_v46  ;;  %v1224_v51 = vsub.f32 %v3580_v60, %v1184_v48  ;;  %v3779_v54 = vpop.eup %2853 }
 0x29b   :  { %v1243_v55 = vmul.f32 1.442695, %v1224_v51  ;;  %v3781_v42 = vpop.eup %2855 }
 0x29c   :  { %v1425_v2 = vpop.xlane.xlu1 %1424  ;;  %v3783_v57 = vpop.xlane.xlu0 %1421  ;;  %1528 = vrot.lane.b32.xlu1 %v3779_v54, %s3106_s20  ;;  %1526 = vrot.lane.b32.xlu0 %v3781_v42, %s3106_s20 }
 0x29d   :  { %2861 = vpow2.f32 %v1243_v55  ;;  %v1465_v62 = vsub.f32 %v3580_v60, %v1425_v2 }
 0x29f   :  { %v3790_v63 = vpop.eup %2857  ;;  %v1484_v11 = vmul.f32 1.442695, %v1465_v62 }
 0x2a0   :  { %v961_v19 = vpop.xlane.xlu1 %960  ;;  %v3792_v20 = vpop.xlane.xlu0 %957  ;;  %1285 = vrot.lane.b32.xlu1 %v3790_v63, %s3104_s5 }
 0x2a1   :  { %2863 = vpow2.f32 %v1484_v11  ;;  %v989_v23 = vsub.f32 %v3605_v10, %v961_v19 }
 0x2a3   :  { %v3797_v21 = vpop.eup %2859  ;;  %v1014_v22 = vmul.f32 1.442695, %v989_v23 }
 0x2a4   :  { %v1202_v16 = vpop.xlane.xlu1 %1201  ;;  %1050 = vrot.lane.b32.xlu1 %v3797_v21, %s3105_s7  ;;  %v3802_v24 = vpop.xlane.xlu0 %1198 }
 0x2a5   :  { %2865 = vpow2.f32 %v1014_v22  ;;  %v1230_v29 = vsub.f32 %v3605_v10, %v1202_v16 }
 0x2a7   :  { %v3805_v36 = vpop.eup %2861  ;;  %v1255_v34 = vmul.f32 1.442695, %v1230_v29 }
 0x2a8   :  { %v1443_v39 = vpop.xlane.xlu1 %1442  ;;  %1291 = vrot.lane.b32.xlu1 %v3805_v36, %s3104_s5  ;;  %v3813_v28 = vpop.xlane.xlu0 %1439 }
 0x2a9   :  { %2867 = vpow2.f32 %v1255_v34  ;;  %v1471_v40 = vsub.f32 %v3605_v10, %v1443_v39 }
 0x2ab   :  { %v3811_v43 = vpop.eup %2863  ;;  %v1496_v13 = vmul.f32 1.442695, %v1471_v40 }
 0x2ac   :  { %4696 = vst [vmem:[#allocation2_spill] sm:$0xff] %v3811_v43  ;;  %v3815_v44 = vpop.xlane.xlu1 %765  ;;  %1532 = vrot.lane.b32.xlu1 %v3811_v43, %s3106_s20  ;;  %v3823_v46 = vpop.xlane.xlu0 %762 }
 0x2ad   :  { %2869 = vpow2.f32 %v1496_v13 }
 0x2ae   :  { %2871 = vpow2.f32 %v821_v61 }
 0x2af   :  { %v3819_v25 = vpop.eup %2865  ;;  %2873 = vpow2.f32 %v819_v8  ;;  %v982_v8 = vsub.f32 %v3583_v0, %v3763_v30 }
 0x2b0   :  { %v3821_v18 = vpop.xlane.xlu1 %783  ;;  %1062 = vrot.lane.b32.xlu1 %v3819_v25, %s3105_s7  ;;  %v3834_v55 = vpop.xlane.xlu0 %780 }
 0x2b3   :  { %v3827_v14 = vpop.eup %2867 }
 0x2b4   :  { %v949_v3 = vpop.xlane.xlu1 %948  ;;  %1303 = vrot.lane.b32.xlu1 %v3827_v14, %s3104_s5  ;;  %v3845_v27 = vpop.xlane.xlu0 %945 }
 0x2b5   :  { %v985_v48 = vsub.f32 %v3635_v52, %v949_v3 }
 0x2b7   :  { %v3832_v51 = vpop.eup %2869  ;;  %v1006_v2 = vmul.f32 1.442695, %v985_v48 }
 0x2b8   :  { %v3836_v62 = vpop.eup %2871  ;;  %v1190_v11 = vpop.xlane.xlu1 %1189  ;;  %1544 = vrot.lane.b32.xlu1 %v3832_v51, %s3106_s20 }
 0x2b9   :  { %2875 = vpow2.f32 %v1006_v2  ;;  %v1226_v19 = vsub.f32 %v3635_v52, %v1190_v11  ;;  %v854_v22 = vsel %vm754_vm5, %v3836_v62, 0.0  ;;  %v3843_v16 = vpop.eup %2873  ;;  %v3855_v3 = vpop.xlane.xlu0 %1186 }
 0x2ba   :  { %v851_v40 = vsel %vm754_vm5, %v3843_v16, 0.0 }
 0x2bb   :  { %v1247_v23 = vmul.f32 1.442695, %v1226_v19  ;;  %855 = vadd.xlane.f32.xlu0 %v854_v22  ;;  %v1223_v22 = vsub.f32 %v3583_v0, %v3772_v50 }
 0x2bc   :  { %v1431_v29 = vpop.xlane.xlu1 %1430 }
 0x2bd   :  { %2877 = vpow2.f32 %v1247_v23  ;;  %v1467_v34 = vsub.f32 %v3635_v52, %v1431_v29  ;;  %v1000_v23 = vmul.f32 1.442695, %v982_v8 }
 0x2bf   :  { %v1488_v39 = vmul.f32 1.442695, %v1467_v34  ;;  %852 = vadd.xlane.f32.xlu0 %v851_v40  ;;  %v3866_v34 = vpop.xlane.xlu0 %1427 }
 0x2c0   :  { %v967_v61 = vpop.xlane.xlu1 %966 }
 0x2c1   :  { %2879 = vpow2.f32 %v1488_v39  ;;  %v991_v1 = vsub.f32 %v3653_v15, %v967_v61  ;;  %v1241_v61 = vmul.f32 1.442695, %v1223_v22  ;;  %v1229_v22 = vsub.f32 %v3607_v59, %v3802_v24 }
 0x2c3   :  { %v3851_v13 = vpop.eup %2875  ;;  %v1018_v48 = vmul.f32 1.442695, %v991_v1  ;;  %v1464_v1 = vsub.f32 %v3583_v0, %v3783_v57 }
 0x2c4   :  { %4697 = vst [vmem:[#allocation3_spill] sm:$0xff] %v3851_v13  ;;  %1054 = vrot.lane.b32.xlu1 %v3851_v13, %s3105_s7  ;;  %v1208_v2 = vpop.xlane.xlu1 %1207 }
 0x2c5   :  { %2881 = vpow2.f32 %v1018_v48  ;;  %v1232_v11 = vsub.f32 %v3653_v15, %v1208_v2  ;;  %v1482_v48 = vmul.f32 1.442695, %v1464_v1  ;;  %v988_v2 = vsub.f32 %v3607_v59, %v3792_v20 }
 0x2c6   :  { %v1470_v1 = vsub.f32 %v3607_v59, %v3813_v28 }
 0x2c7   :  { %v3860_v19 = vpop.eup %2877  ;;  %v1259_v29 = vmul.f32 1.442695, %v1232_v11  ;;  %v3879_v11 = vpop.xlane.xlu0 %963  ;;  %v1012_v57 = vmul.f32 1.442695, %v988_v2 }
 0x2c8   :  { %4698 = vst [vmem:[#allocation4_spill] sm:$0xff] %v3860_v19  ;;  %1295 = vrot.lane.b32.xlu1 %v3860_v19, %s3104_s5  ;;  %v1449_v30 = vpop.xlane.xlu1 %1448 }
 0x2c9   :  { %2883 = vpow2.f32 %v1259_v29  ;;  %v1473_v39 = vsub.f32 %v3653_v15, %v1449_v30 }
 0x2ca   :  { %2885 = vpow2.f32 %v1000_v23 }
 0x2cb   :  { %v3869_v40 = vpop.eup %2879  ;;  %v1500_v8 = vmul.f32 1.442695, %v1473_v39  ;;  %v3893_v20 = vpop.xlane.xlu0 %1204 }
 0x2cc   :  { %4699 = vst [vmem:[#allocation5_spill] sm:$0xff] %v3869_v40  ;;  %1536 = vrot.lane.b32.xlu1 %v3869_v40, %s3106_s20  ;;  %v3887_v29 = vpop.xlane.xlu1 %771 }
 0x2cd   :  { %2887 = vpow2.f32 %v1500_v8 }
 0x2ce   :  { %2889 = vpow2.f32 %v1241_v61  ;;  %v1253_v61 = vmul.f32 1.442695, %v1229_v22 }
 0x2cf   :  { %v3875_v50 = vpop.eup %2881  ;;  %2891 = vpow2.f32 %v1482_v48  ;;  %v1494_v48 = vmul.f32 1.442695, %v1470_v1  ;;  %v3907_v2 = vpop.xlane.xlu0 %1445 }
 0x2d0   :  { %1066 = vrot.lane.b32.xlu1 %v3875_v50, %s3105_s7  ;;  %2893 = vpow2.f32 %v1012_v57  ;;  %v790_v8 = vpop.xlane.xlu1 %789 }
 0x2d1   :  { %2895 = vpow2.f32 %v1253_v61  ;;  %v814_v1 = vsub.f32 %v3653_v15, %v790_v8  ;;  %v806_v15 = vsub.f32 %v3580_v60, %v3815_v44 }
 0x2d2   :  { %2897 = vpow2.f32 %v1494_v48 }
 0x2d3   :  { %v3883_v23 = vpop.eup %2883  ;;  %v3915_v22 = vpop.xlane.xlu0 %768  ;;  %v841_v48 = vmul.f32 1.442695, %v814_v1  ;;  %v825_v8 = vmul.f32 1.442695, %v806_v15 }
 0x2d4   :  { %4700 = vst [vmem:[#allocation6_spill] sm:$0xff] %v3883_v23  ;;  %1307 = vrot.lane.b32.xlu1 %v3883_v23, %s3104_s5  ;;  %v3891_v30 = vpop.eup %2885  ;;  %v955_v28 = vpop.xlane.xlu1 %954 }
 0x2d5   :  { %1048 = vrot.lane.b32.xlu0 %v3891_v30, %s3105_s7  ;;  %2899 = vpow2.f32 %v841_v48  ;;  %v987_v60 = vsub.f32 %v3686_v26, %v955_v28 }
 0x2d7   :  { %v3897_v39 = vpop.eup %2887  ;;  %v787_v7 = vpop.xlane.xlu0 %786 }
 0x2d8   :  { %4701 = vst [vmem:[#allocation7_spill] sm:$0xff] %v3897_v39  ;;  %1548 = vrot.lane.b32.xlu1 %v3897_v39, %s3106_s20  ;;  %v3903_v24 = vpop.eup %2889  ;;  %v1196_v61 = vpop.xlane.xlu1 %1195  ;;  %v813_v19 = vsub.f32 %v3657_v17, %v787_v7  ;;  %v805_v7 = vsub.f32 %v3583_v0, %v3823_v46 }
 0x2d9   :  { %1289 = vrot.lane.b32.xlu0 %v3903_v24, %s3104_s5  ;;  %v3909_v12 = vpop.eup %2891  ;;  %v1228_v46 = vsub.f32 %v3686_v26, %v1196_v61 }
 0x2da   :  { %4702 = vst [vmem:[#allocation8_spill] sm:$0xff] %v3909_v12  ;;  %v3913_v57 = vpop.eup %2893 }
 0x2db   :  { %4703 = vst [vmem:[#allocation9_spill] sm:$0xff] %v3913_v57  ;;  %v3919_v6 = vpop.eup %2895  ;;  %v3942_v44 = vpop.xlane.xlu0 %951 }
 0x2dc   :  { %4704 = vst [vmem:[#allocation10_spill] sm:$0xff] %v3919_v6  ;;  %v3924_v40 = vpop.eup %2897  ;;  %v1437_v13 = vpop.xlane.xlu1 %1436 }
 0x2dd   :  { %1530 = vrot.lane.b32.xlu0 %v3909_v12, %s3106_s20  ;;  %4705 = vst [vmem:[#allocation11_spill] sm:$0xff] %v3924_v40 }
 0x2df   :  { %v3933_v12 = vpop.eup %2899 }
 0x2e0   :  { %v973_v39 = vpop.xlane.xlu1 %972 }
 0x2e1   :  { %1060 = vrot.lane.b32.xlu0 %v3913_v57, %s3105_s7  ;;  %v839_v57 = vmul.f32 1.442695, %v813_v19  ;;  %v884_v19 = vsel %vm754_vm5, %v3933_v12, 0.0 }
 0x2e3   :  { %2901 = vpow2.f32 %v839_v57 }
 0x2e4   :  { %v1214_v23 = vpop.xlane.xlu1 %1213  ;;  %2903 = vpow2.f32 %v825_v8 }
 0x2e5   :  { %1301 = vrot.lane.b32.xlu0 %v3919_v6, %s3104_s5  ;;  %v812_v6 = vsub.f32 %v3605_v10, %v3821_v18  ;;  %v823_v10 = vmul.f32 1.442695, %v805_v7  ;;  %v811_v18 = vsub.f32 %v3607_v59, %v3834_v55  ;;  %v1251_v7 = vmul.f32 1.442695, %v1228_v46 }
 0x2e6   :  { %v1234_v46 = vsub.f32 %v3704_v5, %v1214_v23 }
 0x2e7   :  { %v837_v1 = vmul.f32 1.442695, %v812_v6  ;;  %v1010_v6 = vmul.f32 1.442695, %v987_v60  ;;  %v835_v15 = vmul.f32 1.442695, %v811_v18  ;;  %v993_v18 = vsub.f32 %v3704_v5, %v973_v39 }
 0x2e8   :  { %v1455_v57 = vpop.xlane.xlu1 %1454  ;;  %v1263_v39 = vmul.f32 1.442695, %v1234_v46 }
 0x2e9   :  { %1542 = vrot.lane.b32.xlu0 %v3924_v40, %s3106_s20  ;;  %2905 = vpow2.f32 %v837_v1  ;;  %v1469_v1 = vsub.f32 %v3686_v26, %v1437_v13  ;;  %v1022_v13 = vmul.f32 1.442695, %v993_v18 }
 0x2ea   :  { %2907 = vpow2.f32 %v823_v10 }
 0x2eb   :  { %2909 = vpow2.f32 %v1010_v6  ;;  %v1492_v61 = vmul.f32 1.442695, %v1469_v1 }
 0x2ec   :  { %v3949_v8 = vpop.xlane.xlu1 %777  ;;  %2911 = vpow2.f32 %v835_v15 }
 0x2ed   :  { %v3939_v48 = vpop.eup %2901  ;;  %2913 = vpow2.f32 %v1251_v7 }
 0x2ee   :  { %4706 = vst [vmem:[#allocation12_spill] sm:$0xff] %v3939_v48  ;;  %v881_v0 = vsel %vm754_vm5, %v3939_v48, 0.0  ;;  %v3953_v28 = vpop.eup %2903  ;;  %2915 = vpow2.f32 %v1492_v61  ;;  %v1475_v61 = vsub.f32 %v3704_v5, %v1455_v57  ;;  %v984_v57 = vsub.f32 %v3637_v53, %v3845_v27 }
 0x2ef   :  { %4707 = vst [vmem:[#allocation13_spill] sm:$0xff] %v3953_v28  ;;  %v860_v59 = vsel %vm754_vm5, %v3953_v28, 0.0  ;;  %2917 = vpow2.f32 %v1022_v13 }
 0x2f0   :  { %v3960_v60 = vpop.xlane.xlu1 %795  ;;  %2919 = vpow2.f32 %v1263_v39  ;;  %v1004_v39 = vmul.f32 1.442695, %v984_v57 }
 0x2f3   :  { %v3958_v55 = vpop.eup %2905 }
 0x2f4   :  { %v3967_v6 = vpop.eup %2907  ;;  %v979_v15 = vpop.xlane.xlu1 %978 }
 0x2f5   :  { %v3970_v48 = vpop.eup %2909  ;;  %v857_v7 = vsel %vm754_vm5, %v3967_v6, 0.0 }
 0x2f6   :  { %4708 = vst [vmem:[#allocation14_spill] sm:$0xff] %v3970_v48  ;;  %v3976_v1 = vpop.eup %2911 }
 0x2f7   :  { %4709 = vst [vmem:[#allocation15_spill] sm:$0xff] %v3976_v1  ;;  %v3981_v18 = vpop.eup %2913  ;;  %v875_v23 = vsel %vm754_vm5, %v3976_v1, 0.0 }
 0x2f8   :  { %4710 = vst [vmem:[#allocation16_spill] sm:$0xff] %v3981_v18  ;;  %v3990_v13 = vpop.eup %2915 }
 0x2f9   :  { %4711 = vst [vmem:[#allocation17_spill] sm:$0xff] %v3990_v13 }
 0x2fc   :  { %885 = vadd.xlane.f32.xlu1 %v884_v19  ;;  %v3951_v19 = vpop.xlane.xlu0 %1192 }
 0x300   :  { %882 = vadd.xlane.f32.xlu1 %v881_v0  ;;  %v3962_v10 = vpop.xlane.xlu0 %1433  ;;  %v878_v0 = vsel %vm754_vm5, %v3958_v55, 0.0 }
 0x308   :  { %861 = vadd.xlane.f32.xlu0 %v860_v59  ;;  %v3972_v59 = vpop.xlane.xlu0 %969 }
 0x30c   :  { %879 = vadd.xlane.f32.xlu0 %v878_v0  ;;  %v1220_v0 = vpop.xlane.xlu1 %1219  ;;  %v3987_v40 = vpop.xlane.xlu0 %1210 }
 0x310   :  { %858 = vadd.xlane.f32.xlu0 %v857_v7  ;;  %v1504_v7 = vmul.f32 1.442695, %v1475_v61  ;;  %v1461_v1 = vpop.xlane.xlu1 %1460  ;;  %v1225_v61 = vsub.f32 %v3637_v53, %v3855_v3 }
 0x311   :  { %1058 = vrot.lane.b32.xlu1 %v3970_v48, %s3105_s7  ;;  %v995_v48 = vsub.f32 %v3730_v49, %v979_v15  ;;  %v4001_v15 = vpop.xlane.xlu0 %1451 }
 0x312   :  { %2921 = vpow2.f32 %v1504_v7 }
 0x313   :  { %v1026_v46 = vmul.f32 1.442695, %v995_v48  ;;  %v1245_v48 = vmul.f32 1.442695, %v1225_v61 }
 0x314   :  { %876 = vadd.xlane.f32.xlu0 %v875_v23  ;;  %v1236_v23 = vsub.f32 %v3730_v49, %v1220_v0  ;;  %v1466_v0 = vsub.f32 %v3637_v53, %v3866_v34 }
 0x315   :  { %1299 = vrot.lane.b32.xlu1 %v3981_v18, %s3104_s5  ;;  %v3997_v18 = vpop.eup %2917  ;;  %2923 = vpow2.f32 %v1026_v46  ;;  %v4012_v3 = vpop.xlane.xlu0 %774 }
 0x316   :  { %4712 = vst [vmem:[#allocation18_spill] sm:$0xff] %v3997_v18  ;;  %v1267_v27 = vmul.f32 1.442695, %v1236_v23  ;;  %v4006_v7 = vpop.eup %2919  ;;  %2925 = vpow2.f32 %v1004_v39  ;;  %v1486_v46 = vmul.f32 1.442695, %v1466_v0  ;;  %v1231_v39 = vsub.f32 %v3657_v17, %v3893_v20 }
 0x317   :  { %4713 = vst [vmem:[#allocation19_spill] sm:$0xff] %v4006_v7 }
 0x318   :  { %2927 = vpow2.f32 %v1267_v27  ;;  %v1257_v27 = vmul.f32 1.442695, %v1231_v39 }
 0x319   :  { %1540 = vrot.lane.b32.xlu1 %v3990_v13, %s3106_s20  ;;  %v1477_v13 = vsub.f32 %v3730_v49, %v1461_v1  ;;  %2929 = vpow2.f32 %v1245_v48  ;;  %v990_v1 = vsub.f32 %v3657_v17, %v3879_v11  ;;  %v4024_v61 = vpop.xlane.xlu0 %792  ;;  %v1472_v48 = vsub.f32 %v3657_v17, %v3907_v2 }
 0x31b   :  { %v1508_v57 = vmul.f32 1.442695, %v1477_v13  ;;  %v1016_v34 = vmul.f32 1.442695, %v990_v1 }
 0x31c   :  { %v4014_v43 = vpop.eup %2921 }
 0x31d   :  { %1070 = vrot.lane.b32.xlu1 %v3997_v18, %s3105_s7  ;;  %4714 = vst [vmem:[#allocation20_spill] sm:$0xff] %v4014_v43  ;;  %2931 = vpow2.f32 %v1508_v57  ;;  %v4040_v0 = vpop.xlane.xlu0 %975 }
 0x31e   :  { %2933 = vpow2.f32 %v1486_v46  ;;  %v1498_v46 = vmul.f32 1.442695, %v1472_v48 }
 0x31f   :  { %v4020_v23 = vpop.eup %2923  ;;  %2935 = vpow2.f32 %v1016_v34  ;;  %v802_v34 = vpop.xlane.xlu1 %801 }
 0x320   :  { %4715 = vst [vmem:[#allocation21_spill] sm:$0xff] %v4020_v23  ;;  %v4028_v13 = vpop.eup %2925  ;;  %2937 = vpow2.f32 %v1257_v27 }
 0x321   :  { %1311 = vrot.lane.b32.xlu1 %v4006_v7, %s3104_s5  ;;  %4716 = vst [vmem:[#allocation22_spill] sm:$0xff] %v4028_v13  ;;  %2939 = vpow2.f32 %v1498_v46  ;;  %v4052_v17 = vpop.xlane.xlu0 %1216  ;;  %v818_v46 = vsub.f32 %v3730_v49, %v802_v34 }
 0x322   :  { %v4032_v11 = vpop.eup %2927 }
 0x323   :  { %4717 = vst [vmem:[#allocation23_spill] sm:$0xff] %v4032_v11  ;;  %v4038_v20 = vpop.eup %2929  ;;  %v4062_v48 = vpop.permute.xlu1 %1046 }
 0x324   :  { %4718 = vst [vmem:[#allocation24_spill] sm:$0xff] %v4038_v20 }
 0x325   :  { %1552 = vrot.lane.b32.xlu1 %v4014_v43, %s3106_s20  ;;  %v4060_v27 = vpop.xlane.xlu0 %1457 }
 0x327   :  { %v4044_v57 = vpop.eup %2931  ;;  %v1288_v43 = vpop.permute.xlu1 %1287 }
 0x328   :  { %4719 = vst [vmem:[#allocation25_spill] sm:$0xff] %v4044_v57  ;;  %v4048_v1 = vpop.eup %2933 }
 0x329   :  { %1074 = vrot.lane.b32.xlu1 %v4020_v23, %s3105_s7  ;;  %4720 = vst [vmem:[#allocation26_spill] sm:$0xff] %v4048_v1  ;;  %v4054_v2 = vpop.eup %2935  ;;  %v849_v23 = vmul.f32 1.442695, %v818_v46 }
 0x32a   :  { %1052 = vrot.lane.b32.xlu0 %v4028_v13, %s3105_s7  ;;  %4721 = vst [vmem:[#allocation27_spill] sm:$0xff] %v4054_v2  ;;  %v4058_v39 = vpop.eup %2937 }
 0x32b   :  { %4722 = vst [vmem:[#allocation28_spill] sm:$0xff] %v4058_v39  ;;  %v1529_v18 = vpop.permute.xlu1 %1528  ;;  %2941 = vpow2.f32 %v849_v23 }
 0x32d   :  { %1315 = vrot.lane.b32.xlu1 %v4032_v11, %s3104_s5  ;;  %v799_v11 = vpop.xlane.xlu0 %798 }
 0x32e   :  { %1293 = vrot.lane.b32.xlu0 %v4038_v20, %s3104_s5  ;;  %v817_v7 = vsub.f32 %v3733_v9, %v799_v11  ;;  %v807_v20 = vsub.f32 %v3637_v53, %v3915_v22 }
 0x32f   :  { %v4076_v49 = vpop.permute.xlu1 %1285 }
 0x330   :  { %v827_v34 = vmul.f32 1.442695, %v807_v20  ;;  %v1336_v20 = vsel %vm754_vm5, %v1288_v43, 0.0 }
 0x331   :  { %1556 = vrot.lane.b32.xlu1 %v4044_v57, %s3106_s20  ;;  %v4066_v57 = vpop.eup %2939  ;;  %v1045_v11 = vpop.permute.xlu0 %1044 }
 0x332   :  { %1534 = vrot.lane.b32.xlu0 %v4048_v1, %s3106_s20  ;;  %4723 = vst [vmem:[#allocation29_spill] sm:$0xff] %v4066_v57  ;;  %v808_v1 = vsub.f32 %v3635_v52, %v3887_v29  ;;  %v1092_v43 = vsel %vm754_vm5, %v1045_v11, 0.0  ;;  %v1468_v11 = vsub.f32 %v3689_v41, %v3962_v10  ;;  %v1233_v10 = vsub.f32 %v3707_v4, %v3987_v40 }
 0x333   :  { %v1051_v46 = vpop.permute.xlu1 %1050 }
 0x335   :  { %v4088_v22 = vpop.permute.xlu0 %1526 }
 0x336   :  { %1064 = vrot.lane.b32.xlu0 %v4054_v2, %s3105_s7  ;;  %v847_v2 = vmul.f32 1.442695, %v817_v7 }
 0x337   :  { %v1292_v52 = vpop.permute.xlu1 %1291 }
 0x338   :  { %2943 = vpow2.f32 %v847_v2 }
 0x33a   :  { %1305 = vrot.lane.b32.xlu0 %v4058_v39, %s3104_s5  ;;  %v829_v39 = vmul.f32 1.442695, %v808_v1 }
 0x33c   :  { %2945 = vpow2.f32 %v829_v39  ;;  %v1533_v39 = vpop.permute.xlu1 %1532 }
 0x33d   :  { %2947 = vpow2.f32 %v827_v34 }
 0x33e   :  { %1546 = vrot.lane.b32.xlu0 %v4066_v57, %s3106_s20  ;;  %v4078_v57 = vpop.eup %2941 }
 0x33f   :  { %4724 = vst [vmem:[#allocation30_spill] sm:$0xff] %v4078_v57  ;;  %v896_v23 = vsel %vm754_vm5, %v4078_v57, 0.0 }
 0x340   :  { %v4100_v57 = vpop.permute.xlu1 %1062 }
 0x342   :  { %v4082_v7 = vpop.eup %2943 }
 0x343   :  { %4725 = vst [vmem:[#allocation31_spill] sm:$0xff] %v4082_v7  ;;  %v893_v29 = vsel %vm754_vm5, %v4082_v7, 0.0 }
 0x346   :  { %v4086_v53 = vpop.eup %2945 }
 0x347   :  { %4726 = vst [vmem:[#allocation32_spill] sm:$0xff] %v4086_v53  ;;  %v866_v1 = vsel %vm754_vm5, %v4086_v53, 0.0  ;;  %v4093_v2 = vpop.eup %2947 }
 0x348   :  { %4727 = vst [vmem:[#allocation33_spill] sm:$0xff] %v4093_v2  ;;  %v4095_v34 = vpop.xlane.xlu0 %855 }
 0x34c   :  { %v4105_v7 = vpop.xlane.xlu0 %852 }
 0x355   :  { %897 = vadd.xlane.f32.xlu1 %v896_v23  ;;  %v1577_v23 = vsel %vm754_vm5, %v1529_v18, 0.0  ;;  %v1227_v18 = vsub.f32 %v3689_v41, %v3951_v19 }
 0x357   :  { %v1249_v13 = vmul.f32 1.442695, %v1227_v18 }
 0x359   :  { %894 = vadd.xlane.f32.xlu1 %v893_v29  ;;  %v863_v29 = vsel %vm754_vm5, %v4093_v2, 0.0  ;;  %v1304_v2 = vpop.permute.xlu1 %1303 }
 0x35d   :  { %1337 = vadd.xlane.f32.xlu1 %v1336_v20  ;;  %867 = vadd.xlane.f32.xlu0 %v866_v1  ;;  %v986_v20 = vsub.f32 %v3689_v41, %v3942_v44  ;;  %v1101_v1 = vsel %vm754_vm5, %v1051_v46, 0.0  ;;  %v1545_v44 = vpop.permute.xlu1 %1544  ;;  %v1490_v46 = vmul.f32 1.442695, %v1468_v11 }
 0x35f   :  { %v1008_v53 = vmul.f32 1.442695, %v986_v20  ;;  %v992_v20 = vsub.f32 %v3707_v4, %v3972_v59  ;;  %v1261_v59 = vmul.f32 1.442695, %v1233_v10 }
 0x361   :  { %1578 = vadd.xlane.f32.xlu1 %v1577_v23  ;;  %864 = vadd.xlane.f32.xlu0 %v863_v29  ;;  %v1049_v23 = vpop.permute.xlu0 %1048  ;;  %v1342_v29 = vsel %vm754_vm5, %v1292_v52, 0.0  ;;  %2949 = vpow2.f32 %v1008_v53  ;;  %v1055_v52 = vpop.permute.xlu1 %1054  ;;  %v1020_v53 = vmul.f32 1.442695, %v992_v20 }
 0x362   :  { %2951 = vpow2.f32 %v1249_v13  ;;  %v1601_v13 = vsel %vm754_vm5, %v1545_v44, 0.0  ;;  %v1098_v40 = vsel %vm754_vm5, %v1049_v23, 0.0 }
 0x363   :  { %2953 = vpow2.f32 %v1490_v46 }
 0x364   :  { %2955 = vpow2.f32 %v1020_v53  ;;  %v1107_v53 = vsel %vm754_vm5, %v1055_v52, 0.0 }
 0x365   :  { %1093 = vadd.xlane.f32.xlu1 %v1092_v43  ;;  %v1583_v43 = vsel %vm754_vm5, %v1533_v39, 0.0  ;;  %v4116_v19 = vpop.permute.xlu0 %1289  ;;  %2957 = vpow2.f32 %v1261_v59 }
 0x369   :  { %1102 = vadd.xlane.f32.xlu1 %v1101_v1  ;;  %v1360_v1 = vsel %vm754_vm5, %v1304_v2, 0.0  ;;  %v4123_v39 = vpop.permute.xlu0 %1530  ;;  %v1474_v2 = vsub.f32 %v3707_v4, %v4001_v15 }
 0x36b   :  { %v4121_v18 = vpop.eup %2949 }
 0x36c   :  { %4728 = vst [vmem:[#allocation34_spill] sm:$0xff] %v4121_v18  ;;  %v4130_v11 = vpop.eup %2951 }
 0x36d   :  { %1343 = vadd.xlane.f32.xlu1 %v1342_v29  ;;  %v1296_v29 = vpop.permute.xlu1 %1295  ;;  %4729 = vst [vmem:[#allocation35_spill] sm:$0xff] %v4130_v11  ;;  %v1061_v44 = vpop.permute.xlu0 %1060 }
 0x36e   :  { %v4135_v46 = vpop.eup %2953  ;;  %v1116_v15 = vsel %vm754_vm5, %v1061_v44, 0.0 }
 0x36f   :  { %4730 = vst [vmem:[#allocation36_spill] sm:$0xff] %v4135_v46 }
 0x371   :  { %1584 = vadd.xlane.f32.xlu1 %v1583_v43  ;;  %v1502_v43 = vmul.f32 1.442695, %v1474_v2  ;;  %v1537_v20 = vpop.permute.xlu1 %1536  ;;  %v4155_v52 = vpop.permute.xlu0 %1301 }
 0x372   :  { %v1589_v2 = vsel %vm754_vm5, %v1537_v20, 0.0 }
 0x373   :  { %2959 = vpow2.f32 %v1502_v43 }
 0x375   :  { %1361 = vadd.xlane.f32.xlu1 %v1360_v1  ;;  %v4140_v1 = vpop.eup %2955  ;;  %v1067_v23 = vpop.permute.xlu1 %1066 }
 0x376   :  { %4731 = vst [vmem:[#allocation37_spill] sm:$0xff] %v4140_v1  ;;  %v4145_v10 = vpop.eup %2957  ;;  %v1125_v43 = vsel %vm754_vm5, %v1067_v23, 0.0  ;;  %v4162_v44 = vpop.permute.xlu0 %1542  ;;  %v809_v23 = vsub.f32 %v3689_v41, %v4012_v3 }
 0x377   :  { %1056 = vrot.lane.b32.xlu0 %v4121_v18, %s3105_s7  ;;  %4732 = vst [vmem:[#allocation38_spill] sm:$0xff] %v4145_v10 }
 0x379   :  { %1602 = vadd.xlane.f32.xlu1 %v1601_v13  ;;  %v1348_v13 = vsel %vm754_vm5, %v1296_v29, 0.0 }
 0x37b   :  { %1297 = vrot.lane.b32.xlu0 %v4130_v11, %s3104_s5 }
 0x37d   :  { %1099 = vadd.xlane.f32.xlu1 %v1098_v40  ;;  %v4150_v59 = vpop.eup %2959  ;;  %v4153_v40 = vpop.permute.xlu1 %1307 }
 0x37e   :  { %4733 = vst [vmem:[#allocation39_spill] sm:$0xff] %v4150_v59 }
 0x37f   :  { %1538 = vrot.lane.b32.xlu0 %v4135_v46, %s3106_s20 }
 0x381   :  { %1117 = vadd.xlane.f32.xlu1 %v1116_v15  ;;  %v4160_v29 = vpop.permute.xlu1 %1548  ;;  %v810_v15 = vsub.f32 %v3686_v26, %v3949_v8  ;;  %v831_v26 = vmul.f32 1.442695, %v809_v23  ;;  %v815_v8 = vsub.f32 %v3707_v4, %v4024_v61 }
 0x383   :  { %1068 = vrot.lane.b32.xlu0 %v4140_v1, %s3105_s7 }
 0x385   :  { %1108 = vadd.xlane.f32.xlu1 %v1107_v53 }
 0x387   :  { %1309 = vrot.lane.b32.xlu0 %v4145_v10, %s3104_s5  ;;  %v816_v10 = vsub.f32 %v3704_v5, %v3960_v60  ;;  %v843_v5 = vmul.f32 1.442695, %v815_v8 }
 0x389   :  { %1349 = vadd.xlane.f32.xlu1 %v1348_v13  ;;  %v4166_v53 = vpop.xlane.xlu1 %885  ;;  %v833_v13 = vmul.f32 1.442695, %v810_v15 }
 0x38b   :  { %1550 = vrot.lane.b32.xlu0 %v4150_v59, %s3106_s20  ;;  %2961 = vpow2.f32 %v833_v13 }
 0x38d   :  { %1590 = vadd.xlane.f32.xlu1 %v1589_v2  ;;  %v4174_v2 = vpop.xlane.xlu1 %882 }
 0x38e   :  { %4734 = vst [vmem:[#allocation40_spill] sm:$0xff] %v4174_v2 }
 0x391   :  { %1126 = vadd.xlane.f32.xlu1 %v1125_v43  ;;  %v845_v43 = vmul.f32 1.442695, %v816_v10  ;;  %v1059_v15 = vpop.permute.xlu1 %1058 }
 0x392   :  { %v1113_v18 = vsel %vm754_vm5, %v1059_v15, 0.0 }
 0x393   :  { %2963 = vpow2.f32 %v845_v43 }
 0x394   :  { %2965 = vpow2.f32 %v831_v26 }
 0x395   :  { %v4168_v20 = vpop.xlane.xlu0 %861  ;;  %v4184_v11 = vpop.eup %2961  ;;  %2967 = vpow2.f32 %v843_v5 }
 0x396   :  { %4736 = vst [vmem:[#allocation42_spill] sm:$0xff] %v4184_v11  ;;  %v4187_v2 = vpop.permute.xlu1 %1299  ;;  %v872_v3 = vsel %vm754_vm5, %v4184_v11, 0.0 }
 0x399   :  { %v4172_v59 = vpop.xlane.xlu0 %879 }
 0x39a   :  { %v4195_v61 = vpop.permute.xlu1 %1540 }
 0x39d   :  { %v4178_v1 = vpop.xlane.xlu0 %858  ;;  %v4193_v4 = vpop.eup %2963 }
 0x39e   :  { %4737 = vst [vmem:[#allocation43_spill] sm:$0xff] %v4193_v4  ;;  %v890_v23 = vsel %vm754_vm5, %v4193_v4, 0.0  ;;  %v4201_v43 = vpop.eup %2965 }
 0x39f   :  { %4738 = vst [vmem:[#allocation44_spill] sm:$0xff] %v4201_v43  ;;  %v869_v8 = vsel %vm754_vm5, %v4201_v43, 0.0  ;;  %v4205_v5 = vpop.eup %2967 }
 0x3a0   :  { %4739 = vst [vmem:[#allocation45_spill] sm:$0xff] %v4205_v5  ;;  %v887_v11 = vsel %vm754_vm5, %v4205_v5, 0.0 }
 0x3a1   :  { %v4182_v46 = vpop.xlane.xlu0 %876 }
 0x3a2   :  { %4735 = vst [vmem:[#allocation41_spill] sm:$0xff] %v4182_v46 }
 0x3a5   :  { %v1053_v60 = vpop.permute.xlu0 %1052 }
 0x3a6   :  { %v1104_v13 = vsel %vm754_vm5, %v1053_v60, 0.0 }
 0x3a7   :  { %1105 = vadd.xlane.f32.xlu1 %v1104_v13  ;;  %v4208_v13 = vpop.permute.xlu1 %1070 }
 0x3a9   :  { %v4189_v41 = vpop.permute.xlu0 %1293 }
 0x3aa   :  { %873 = vadd.xlane.f32.xlu0 %v872_v3 }
 0x3ab   :  { %v1312_v43 = vpop.permute.xlu1 %1311 }
 0x3ad   :  { %v4197_v10 = vpop.permute.xlu0 %1534 }
 0x3ae   :  { %891 = vadd.xlane.f32.xlu0 %v890_v23  ;;  %v994_v23 = vsub.f32 %v3733_v9, %v4040_v0 }
 0x3af   :  { %v1553_v46 = vpop.permute.xlu1 %1552 }
 0x3b1   :  { %v1065_v26 = vpop.permute.xlu0 %1064 }
 0x3b2   :  { %v1122_v60 = vsel %vm754_vm5, %v1065_v26, 0.0  ;;  %870 = vadd.xlane.f32.xlu0 %v869_v8  ;;  %v1024_v26 = vmul.f32 1.442695, %v994_v23  ;;  %v1235_v8 = vsub.f32 %v3733_v9, %v4052_v17 }
 0x3b3   :  { %1123 = vadd.xlane.f32.xlu1 %v1122_v60  ;;  %v1372_v60 = vsel %vm754_vm5, %v1312_v43, 0.0  ;;  %v1075_v15 = vpop.permute.xlu1 %1074 }
 0x3b4   :  { %2969 = vpow2.f32 %v1024_v26  ;;  %v1265_v5 = vmul.f32 1.442695, %v1235_v8 }
 0x3b5   :  { %v1306_v3 = vpop.permute.xlu0 %1305 }
 0x3b6   :  { %v1363_v4 = vsel %vm754_vm5, %v1306_v3, 0.0  ;;  %888 = vadd.xlane.f32.xlu0 %v887_v11  ;;  %v1476_v11 = vsub.f32 %v3733_v9, %v4060_v27  ;;  %2971 = vpow2.f32 %v1265_v5 }
 0x3b7   :  { %1364 = vadd.xlane.f32.xlu1 %v1363_v4  ;;  %v1613_v4 = vsel %vm754_vm5, %v1553_v46, 0.0  ;;  %v4234_v9 = vpop.permute.xlu1 %1315 }
 0x3b8   :  { %v1506_v0 = vmul.f32 1.442695, %v1476_v11 }
 0x3b9   :  { %v1547_v3 = vpop.permute.xlu0 %1546 }
 0x3ba   :  { %2973 = vpow2.f32 %v1506_v0  ;;  %v1095_v0 = vsel %vm754_vm5, %v4062_v48, 0.0  ;;  %v1119_v48 = vsel %vm754_vm5, %v4100_v57, 0.0 }
 0x3bb   :  { %1114 = vadd.xlane.f32.xlu1 %v1113_v18  ;;  %v4236_v27 = vpop.permute.xlu1 %1556  ;;  %2975 = vrcp.f32 %v4166_v53  ;;  %v1595_v53 = vsel %vm754_vm5, %v4195_v61, 0.0 }
 0x3be   :  { %v4222_v18 = vpop.eup %2969 }
 0x3bf   :  { %1373 = vadd.xlane.f32.xlu1 %v1372_v60  ;;  %4740 = vst [vmem:[#allocation46_spill] sm:$0xff] %v4222_v18 }
 0x3c0   :  { %v4226_v17 = vpop.eup %2971 }
 0x3c1   :  { %4741 = vst [vmem:[#allocation47_spill] sm:$0xff] %v4226_v17 }
 0x3c3   :  { %1614 = vadd.xlane.f32.xlu1 %v1613_v4 }
 0x3c4   :  { %v4230_v43 = vpop.eup %2973 }
 0x3c5   :  { %4742 = vst [vmem:[#allocation48_spill] sm:$0xff] %v4230_v43 }
 0x3cc   :  { %1072 = vrot.lane.b32.xlu0 %v4222_v18, %s3105_s7 }
 0x3d0   :  { %1313 = vrot.lane.b32.xlu0 %v4226_v17, %s3104_s5 }
 0x3d4   :  { %1554 = vrot.lane.b32.xlu0 %v4230_v43, %s3106_s20 }
 0x3e2   :  { %v4238_v46 = vpop.xlane.xlu1 %897 }
 0x3e3   :  { %4743 = vst [vmem:[#allocation49_spill] sm:$0xff] %v4238_v46 }
 0x3e6   :  { %v4240_v5 = vpop.xlane.xlu1 %894 }
 0x3e7   :  { %4744 = vst [vmem:[#allocation50_spill] sm:$0xff] %v4240_v5  ;;  %v1333_v5 = vsel %vm754_vm5, %v4076_v49, 0.0  ;;  %v1339_v49 = vsel %vm754_vm5, %v4116_v19, 0.0  ;;  %v1598_v19 = vsel %vm754_vm5, %v4162_v44, 0.0 }
 0x3ea   :  { %v4242_v23 = vpop.xlane.xlu1 %1337  ;;  %v4244_v26 = vpop.xlane.xlu0 %867 }
 0x3eb   :  { %4745 = vst [vmem:[#allocation51_spill] sm:$0xff] %v4244_v26  ;;  %v1574_v26 = vsel %vm754_vm5, %v4088_v22, 0.0 }
 0x3ee   :  { %v4246_v8 = vpop.xlane.xlu1 %1578  ;;  %v4248_v60 = vpop.xlane.xlu0 %864 }
 0x3ef   :  { %4746 = vst [vmem:[#allocation52_spill] sm:$0xff] %v4248_v60 }
 0x3f2   :  { %v4250_v11 = vpop.xlane.xlu1 %1093  ;;  %v1057_v4 = vpop.permute.xlu0 %1056 }
 0x3f3   :  { %v1110_v43 = vsel %vm754_vm5, %v1057_v4, 0.0  ;;  %1096 = vadd.xlane.f32.xlu0 %v1095_v0 }
 0x3f4   :  { %1111 = vadd.xlane.f32.xlu1 %v1110_v43 }
 0x3f6   :  { %v4255_v17 = vpop.xlane.xlu1 %1102  ;;  %v1298_v18 = vpop.permute.xlu0 %1297 }
 0x3f7   :  { %1334 = vadd.xlane.f32.xlu0 %v1333_v5  ;;  %v1137_v5 = vsel %vm754_vm5, %v1075_v15, 0.0 }
 0x3fa   :  { %v4259_v46 = vpop.xlane.xlu1 %1343  ;;  %v1539_v60 = vpop.permute.xlu0 %1538 }
 0x3fb   :  { %1575 = vadd.xlane.f32.xlu0 %v1574_v26  ;;  %v1580_v26 = vsel %vm754_vm5, %v4123_v39, 0.0 }
 0x3fe   :  { %v4263_v28 = vpop.xlane.xlu1 %1584  ;;  %v1069_v43 = vpop.permute.xlu0 %1068 }
 0x3ff   :  { %v1128_v4 = vsel %vm754_vm5, %v1069_v43, 0.0  ;;  %1120 = vadd.xlane.f32.xlu0 %v1119_v48  ;;  %v1357_v48 = vsel %vm754_vm5, %v4155_v52, 0.0 }
 0x400   :  { %1129 = vadd.xlane.f32.xlu1 %v1128_v4  ;;  %v1366_v4 = vsel %vm754_vm5, %v4153_v40, 0.0  ;;  %v1604_v40 = vsel %vm754_vm5, %v1547_v3, 0.0  ;;  %v1131_v3 = vsel %vm754_vm5, %v4208_v13, 0.0  ;;  %v1378_v13 = vsel %vm754_vm5, %v4234_v9, 0.0 }
 0x401   :  { %v4747_v9 = vpack.i.bf16 %v3460_v32, %v3457_v31  ;;  %v2027_v31 = vld [vmem:[%s4646_s8 + $0x8] sm:$0xff]  ;;  %v2028_v32 = vld [vmem:[%s4646_s8 + $0x10] sm:$0xff] }
 0x402   :  { %v4268_v0 = vpop.xlane.xlu1 %1361 }
 0x403   :  { %1340 = vadd.xlane.f32.xlu0 %v1339_v49  ;;  %v1607_v49 = vsel %vm754_vm5, %v4160_v29, 0.0  ;;  %v1354_v29 = vsel %vm754_vm5, %v4187_v2, 0.0  ;;  %v1351_v2 = vsel %vm754_vm5, %v1298_v18, 0.0 }
 0x404   :  { %1138 = vadd.xlane.f32.xlu1 %v1137_v5  ;;  %v1345_v5 = vsel %vm754_vm5, %v4189_v41, 0.0 }
 0x406   :  { %v4273_v22 = vpop.xlane.xlu1 %1602 }
 0x407   :  { %1581 = vadd.xlane.f32.xlu0 %v1580_v26  ;;  %v1586_v26 = vsel %vm754_vm5, %v4197_v10, 0.0 }
 0x40a   :  { %v4277_v57 = vpop.xlane.xlu1 %1099 }
 0x40b   :  { %1358 = vadd.xlane.f32.xlu0 %v1357_v48  ;;  %v2976_v48 = vpop.eup %2975 }
 0x40c   :  { %v926_v41 = vmul.f32 %v2976_v48, %v3933_v12  ;;  %v1592_v12 = vsel %vm754_vm5, %v1539_v60, 0.0  ;;  %v1619_v60 = vsel %vm754_vm5, %v4236_v27, 0.0  ;;  %v4748_v27 = vpack.i.bf16 %v3466_v33, %v3463_v58  ;;  %v2029_v33 = vld [vmem:[%s4646_s8 + $0x18] sm:$0xff] }
 0x40e   :  { %v4281_v43 = vpop.xlane.xlu1 %1117 }
 0x40f   :  { %1599 = vadd.xlane.f32.xlu0 %v1598_v19 }
 0x412   :  { %v4285_v15 = vpop.xlane.xlu1 %1108 }
 0x413   :  { %1367 = vadd.xlane.f32.xlu0 %v1366_v4 }
 0x416   :  { %v4289_v39 = vpop.xlane.xlu1 %1349 }
 0x417   :  { %1608 = vadd.xlane.f32.xlu0 %v1607_v49  ;;  %v1310_v49 = vpop.permute.xlu0 %1309 }
 0x418   :  { %v1369_v61 = vsel %vm754_vm5, %v1310_v49, 0.0  ;;  %v4749_v49 = vpack.i.bf16 %v3472_v38, %v3469_v35  ;;  %v4360_v35 = vpack.c.bf16 %v2029_v33, %v2028_v32 }
 0x41a   :  { %v4293_v52 = vpop.xlane.xlu1 %1590 }
 0x41b   :  { %1346 = vadd.xlane.f32.xlu0 %v1345_v5  ;;  %v1551_v5 = vpop.permute.xlu0 %1550 }
 0x41e   :  { %v1127_v44 = vpop.xlane.xlu1 %1126 }
 0x41f   :  { %2977 = vrcp.f32 %v1127_v44  ;;  %1587 = vadd.xlane.f32.xlu0 %v1586_v26  ;;  %v1610_v26 = vsel %vm754_vm5, %v1551_v5, 0.0 }
 0x420   :  { %2979 = vrcp.f32 %v4095_v34 }
 0x423   :  { %1605 = vadd.xlane.f32.xlu0 %v1604_v40 }
 0x427   :  { %1355 = vadd.xlane.f32.xlu0 %v1354_v29 }
 0x429   :  { %v2978_v19 = vpop.eup %2977 }
 0x42a   :  { %v1167_v4 = vmul.f32 %v2978_v19, %v3875_v50  ;;  %v2980_v34 = vpop.eup %2979 }
 0x42b   :  { %1596 = vadd.xlane.f32.xlu0 %v1595_v53 }
 0x42c   :  { %v4308_v10 = vsel %vm754_vm5, %v926_v41, %v1167_v4 }
 0x42f   :  { %1132 = vadd.xlane.f32.xlu0 %v1131_v3 }
 0x433   :  { %1352 = vadd.xlane.f32.xlu0 %v1351_v2  ;;  %v2026_v2 = vld [vmem:[%s4646_s8] sm:$0xff] }
 0x434   :  { %v4353_v58 = vpack.c.bf16 %v2027_v31, %v2026_v2 }
 0x436   :  { %2799 = vmatprep.subr.bf16.mxu1 %v4353_v58 }
 0x437   :  { %1593 = vadd.xlane.f32.xlu0 %v1592_v12  ;;  %v4314_v50 = vpop.xlane.xlu0 %873  ;;  %2801 = vmatpush3.bf16.msra.mxu1 %v4353_v58 }
 0x438   :  { %2800 = vmatprep.subr.bf16.mxu1 %v4360_v35 }
 0x43b   :  { %1370 = vadd.xlane.f32.xlu0 %v1369_v61  ;;  %v4317_v44 = vpop.xlane.xlu0 %891  ;;  %2802 = vmatpush3.bf16.msra.mxu1 %v4360_v35  ;;  %v916_v61 = vmul.f32 %v2980_v34, %v3836_v62 }
 0x43f   :  { %1611 = vadd.xlane.f32.xlu0 %v1610_v26  ;;  %v4320_v40 = vpop.xlane.xlu0 %870 }
 0x443   :  { %1379 = vadd.xlane.f32.xlu0 %v1378_v13  ;;  %v4324_v18 = vpop.xlane.xlu0 %888 }
 0x447   :  { %1620 = vadd.xlane.f32.xlu0 %v1619_v60  ;;  %v1073_v48 = vpop.permute.xlu0 %1072 }
 0x448   :  { %v1134_v29 = vsel %vm754_vm5, %v1073_v48, 0.0 }
 0x449   :  { %1135 = vadd.xlane.f32.xlu1 %v1134_v29 }
 0x44b   :  { %v1314_v19 = vpop.permute.xlu0 %1313 }
 0x44c   :  { %v1375_v41 = vsel %vm754_vm5, %v1314_v19, 0.0 }
 0x44d   :  { %1376 = vadd.xlane.f32.xlu1 %v1375_v41 }
 0x44f   :  { %v1555_v4 = vpop.permute.xlu0 %1554 }
 0x450   :  { %v1616_v53 = vsel %vm754_vm5, %v1555_v4, 0.0 }
 0x451   :  { %1617 = vadd.xlane.f32.xlu0 %v1616_v53 }
 0x45e   :  { %2838 = vrot.lane.b32.xlu1 %v4747_v9, %s3104_s5 }
 0x462   :  { %2843 = vrot.lane.b32.xlu1 %v4748_v27, %s3104_s5 }
 0x467   :  { %2833 = vrot.lane.b32.xlu0 %v4749_v49, %s3104_s5 }
 0x480   :  { %v1097_v3 = vpop.xlane.xlu0 %1096 }
 0x481   :  { %2981 = vrcp.f32 %v1097_v3 }
 0x482   :  { %2983 = vrcp.f32 %v4105_v7 }
 0x483   :  { %2985 = vrcp.f32 %v4250_v11 }
 0x484   :  { %2987 = vrcp.f32 %v4242_v23  ;;  %v1335_v38 = vpop.xlane.xlu0 %1334 }
 0x485   :  { %2989 = vrcp.f32 %v1335_v38  ;;  %v1106_v38 = vpop.xlane.xlu1 %1105 }
 0x486   :  { %2991 = vrcp.f32 %v4168_v20 }
 0x487   :  { %2993 = vrcp.f32 %v4172_v59 }
 0x488   :  { %2995 = vrcp.f32 %v4246_v8  ;;  %v1576_v7 = vpop.xlane.xlu0 %1575 }
 0x489   :  { %2997 = vrcp.f32 %v1576_v7 }
 0x48a   :  { %2999 = vrcp.f32 %v4178_v1 }
 0x48b   :  { %v2982_v23 = vpop.eup %2981  ;;  %3001 = vrcp.f32 %v4268_v0 }
 0x48c   :  { %v2984_v11 = vpop.eup %2983  ;;  %3003 = vrcp.f32 %v4273_v22  ;;  %v1121_v5 = vpop.xlane.xlu0 %1120  ;;  %v1157_v20 = vmul.f32 %v2982_v23, %v3761_v37 }
 0x48d   :  { %v2986_v12 = vpop.eup %2985  ;;  %3005 = vrcp.f32 %v1121_v5  ;;  %v915_v62 = vmul.f32 %v2984_v11, %v3843_v16 }
 0x48e   :  { %v2988_v59 = vpop.eup %2987  ;;  %3007 = vrcp.f32 %v4255_v17  ;;  %v1156_v26 = vmul.f32 %v2986_v12, %v3770_v47  ;;  %v1655_v37 = vsel %vm754_vm5, %v916_v61, %v1157_v20  ;;  %v4750_v12 = vld [vmem:[#allocation13_spill] sm:$0xff] }
 0x48f   :  { %v2990_v8 = vpop.eup %2989  ;;  %3009 = vrcp.f32 %v4277_v57  ;;  %v1398_v17 = vmul.f32 %v2988_v59, %v3768_v45  ;;  %v4413_v59 = vpop.xlane.xlu1 %1123 }
 0x490   :  { %v2992_v1 = vpop.eup %2991  ;;  %3011 = vrcp.f32 %v4259_v46  ;;  %v1341_v0 = vpop.xlane.xlu0 %1340  ;;  %v1397_v13 = vmul.f32 %v2990_v8, %v3790_v63  ;;  %v1654_v46 = vsel %vm754_vm5, %v915_v62, %v1156_v26  ;;  %v4751_v8 = vld [vmem:[#allocation2_spill] sm:$0xff]  ;;  %v4752_v26 = vld [vmem:[#allocation8_spill] sm:$0xff] }
 0x491   :  { %v2994_v22 = vpop.eup %2993  ;;  %3013 = vrcp.f32 %v1341_v0  ;;  %v1671_v19 = vsel %vm62_vm0, %v1655_v37, %v1398_v17  ;;  %v918_v20 = vmul.f32 %v2992_v1, %v4750_v12  ;;  %v4754_v37 = vld [vmem:[#allocation52_spill] sm:$0xff] }
 0x492   :  { %v2996_v60 = vpop.eup %2995  ;;  %3015 = vrcp.f32 %v4263_v28  ;;  %v1670_v45 = vsel %vm62_vm0, %v1654_v46, %v1397_v13  ;;  %v924_v9 = vmul.f32 %v2994_v22, %v3958_v55  ;;  %v4753_v13 = vld [vmem:[#allocation51_spill] sm:$0xff] }
 0x493   :  { %v2998_v57 = vpop.eup %2997  ;;  %v1639_v41 = vmul.f32 %v2996_v60, %v3779_v54  ;;  %v4427_v17 = vpop.xlane.xlu1 %1364 }
 0x494   :  { %v3000_v48 = vpop.eup %2999  ;;  %v1582_v29 = vpop.xlane.xlu0 %1581  ;;  %v1638_v47 = vmul.f32 %v2998_v57, %v3781_v42 }
 0x495   :  { %v3002_v63 = vpop.eup %3001  ;;  %3017 = vrcp.f32 %v1582_v29  ;;  %v1688_v42 = vsel %vm1686_vm7, %v1671_v19, %v1639_v41 }
 0x496   :  { %v3004_v28 = vpop.eup %3003  ;;  %v1687_v16 = vsel %vm1686_vm7, %v1670_v45, %v1638_v47  ;;  %v1406_v3 = vmul.f32 %v3002_v63, %v3827_v14  ;;  %v4755_v47 = vld [vmem:[#allocation6_spill] sm:$0xff] }
 0x497   :  { %v3006_v4 = vpop.eup %3005  ;;  %2599 = vmatprep.mubr.msk.f32.mxu0 %vm1735_vm6, %v1687_v16  ;;  %v1647_v31 = vmul.f32 %v3004_v28, %v3832_v51  ;;  %v917_v51 = vmul.f32 %v3000_v48, %v3967_v6  ;;  %v1115_v48 = vpop.xlane.xlu1 %1114 }
 0x498   :  { %v3008_v53 = vpop.eup %3007  ;;  %v1165_v27 = vmul.f32 %v3006_v4, %v3819_v25  ;;  %2600 = vmatmul.mubr.msk.f32.vlgmr.msra.gmra.mrb[24].mxu0 %vm1735_vm6, %v1688_v42  ;;  %v4395_v54 = vpop.xlane.xlu0 %1358 }
 0x499   :  { %v3010_v49 = vpop.eup %3009  ;;  %2778 = vmatpush3.bf16.msra.mxu0 %v3536_v56  ;;  %v1159_v14 = vmul.f32 %v3008_v53, %v3797_v21 }
 0x49a   :  { %v3012_v2 = vpop.eup %3011  ;;  %v1663_v32 = vsel %vm754_vm5, %v924_v9, %v1165_v27  ;;  %v1158_v25 = vmul.f32 %v3010_v49, %v3891_v30  ;;  %v4757_v49 = vld [vmem:[#allocation22_spill] sm:$0xff] }
 0x49b   :  { %v3014_v33 = vpop.eup %3013  ;;  %v1679_v55 = vsel %vm62_vm0, %v1663_v32, %v1406_v3  ;;  %v1400_v11 = vmul.f32 %v3012_v2, %v3805_v36  ;;  %v4438_v42 = vpop.xlane.xlu1 %1373  ;;  %v4759_v32 = vld [vmem:[#allocation24_spill] sm:$0xff] }
 0x49c   :  { %v3016_v7 = vpop.eup %3015  ;;  %v4403_v34 = vpop.xlane.xlu0 %1599  ;;  %v4406_v23 = vsel %vm1686_vm7, %v1679_v55, %v1647_v31  ;;  %v1399_v56 = vmul.f32 %v3014_v33, %v3903_v24  ;;  %v1656_v22 = vsel %vm754_vm5, %v917_v51, %v1158_v25  ;;  %v1657_v24 = vsel %vm754_vm5, %v918_v20, %v1159_v14  ;;  %v4758_v31 = vld [vmem:[#allocation3_spill] sm:$0xff] }
 0x49d   :  { %v1641_v30 = vmul.f32 %v3016_v7, %v4751_v8  ;;  %v1673_v36 = vsel %vm62_vm0, %v1657_v24, %v1400_v11  ;;  %v4761_v7 = vld [vmem:[#allocation4_spill] sm:$0xff]  ;;  %v4764_v8 = vld [vmem:[#allocation26_spill] sm:$0xff] }
 0x49e   :  { %v1672_v21 = vsel %vm62_vm0, %v1656_v22, %v1399_v56  ;;  %v4762_v56 = vld [vmem:[#allocation32_spill] sm:$0xff] }
 0x49f   :  { %v3018_v5 = vpop.eup %3017  ;;  %v1690_v1 = vsel %vm1686_vm7, %v1673_v36, %v1641_v30  ;;  %v4449_v11 = vpop.xlane.xlu1 %1614 }
 0x4a0   :  { %v1368_v61 = vpop.xlane.xlu0 %1367  ;;  %v1640_v0 = vmul.f32 %v3018_v5, %v4752_v26  ;;  %v4763_v5 = vld [vmem:[#allocation5_spill] sm:$0xff] }
 0x4a1   :  { %3019 = vrcp.f32 %v1368_v61  ;;  %v4765_v26 = vld [vmem:[#allocation41_spill] sm:$0xff] }
 0x4a2   :  { %v1689_v6 = vsel %vm1686_vm7, %v1672_v21, %v1640_v0  ;;  %3021 = vrcp.f32 %v4753_v13 }
 0x4a3   :  { %2602 = vmatprep.mubr.msk.f32.mxu0 %vm1735_vm6, %v1689_v6  ;;  %3023 = vrcp.f32 %v4754_v37  ;;  %v1112_v6 = vpop.xlane.xlu1 %1111 }
 0x4a4   :  { %2603 = vmatmul.mubr.msk.f32.gmra.mrb[26].mxu0 %vm1735_vm6, %v1690_v1  ;;  %v1609_v60 = vpop.xlane.xlu0 %1608 }
 0x4a5   :  { %3025 = vrcp.f32 %v1609_v60 }
 0x4a6   :  { %3027 = vrcp.f32 %v4285_v15 }
 0x4a7   :  { %3029 = vrcp.f32 %v1106_v38  ;;  %v4760_v38 = vld [vmem:[#allocation33_spill] sm:$0xff] }
 0x4a8   :  { %3031 = vrcp.f32 %v4289_v39  ;;  %v1347_v62 = vpop.xlane.xlu0 %1346  ;;  %v4756_v39 = vld [vmem:[#allocation7_spill] sm:$0xff] }
 0x4a9   :  { %3033 = vrcp.f32 %v1347_v62 }
 0x4aa   :  { %3035 = vrcp.f32 %v4293_v52 }
 0x4ab   :  { %v3020_v57 = vpop.eup %3019 }
 0x4ac   :  { %v1588_v29 = vpop.xlane.xlu0 %1587  ;;  %v1408_v46 = vmul.f32 %v3020_v57, %v4755_v47  ;;  %v3022_v19 = vpop.eup %3021 }
 0x4ad   :  { %3037 = vrcp.f32 %v1588_v29  ;;  %v3024_v63 = vpop.eup %3023  ;;  %v920_v51 = vmul.f32 %v3022_v19, %v4762_v56  ;;  %v4776_v56 = vld [vmem:[#allocation36_spill] sm:$0xff] }
 0x4ae   :  { %v1681_v41 = vsel %vm62_vm0, %v4308_v10, %v1408_v46  ;;  %v919_v55 = vmul.f32 %v3024_v63, %v4760_v38  ;;  %3039 = vrcp.f32 %v4765_v26 }
 0x4af   :  { %v3026_v45 = vpop.eup %3025  ;;  %3041 = vrcp.f32 %v4281_v43 }
 0x4b0   :  { %v3028_v15 = vpop.eup %3027  ;;  %v4435_v28 = vpop.xlane.xlu0 %1605  ;;  %v1649_v16 = vmul.f32 %v3026_v45, %v4756_v39  ;;  %3043 = vrcp.f32 %v4314_v50 }
 0x4b1   :  { %v3030_v4 = vpop.eup %3029  ;;  %v1161_v10 = vmul.f32 %v3028_v15, %v4758_v31  ;;  %3045 = vrcp.f32 %v4320_v40  ;;  %v4767_v15 = vld [vmem:[#allocation14_spill] sm:$0xff] }
 0x4b2   :  { %v3032_v52 = vpop.eup %3031  ;;  %v4441_v53 = vsel %vm1686_vm7, %v1681_v41, %v1649_v16  ;;  %v1160_v3 = vmul.f32 %v3030_v4, %v4757_v49  ;;  %3047 = vrcp.f32 %v1115_v48  ;;  %v1130_v41 = vpop.xlane.xlu1 %1129  ;;  %v4768_v16 = vld [vmem:[#allocation35_spill] sm:$0xff]  ;;  %v4769_v4 = vld [vmem:[#allocation9_spill] sm:$0xff] }
 0x4b3   :  { %v3034_v9 = vpop.eup %3033  ;;  %v1402_v25 = vmul.f32 %v3032_v52, %v4761_v7  ;;  %v1659_v22 = vsel %vm754_vm5, %v920_v51, %v1161_v10  ;;  %3049 = vrcp.f32 %v1112_v6  ;;  %v4772_v10 = vld [vmem:[#allocation42_spill] sm:$0xff] }
 0x4b4   :  { %v3036_v27 = vpop.eup %3035  ;;  %v1356_v2 = vpop.xlane.xlu0 %1355  ;;  %v1401_v33 = vmul.f32 %v3034_v9, %v4759_v32  ;;  %v1658_v61 = vsel %vm754_vm5, %v919_v55, %v1160_v3  ;;  %3051 = vrcp.f32 %v4395_v54  ;;  %v4766_v54 = vld [vmem:[#allocation34_spill] sm:$0xff]  ;;  %v4770_v9 = vld [vmem:[#allocation44_spill] sm:$0xff] }
 0x4b5   :  { %v1643_v12 = vmul.f32 %v3036_v27, %v4763_v5  ;;  %v1675_v24 = vsel %vm62_vm0, %v1659_v22, %v1402_v25  ;;  %3053 = vrcp.f32 %v1356_v2  ;;  %v4771_v3 = vld [vmem:[#allocation16_spill] sm:$0xff]  ;;  %v4774_v55 = vld [vmem:[#allocation10_spill] sm:$0xff]  ;;  %v4775_v25 = vld [vmem:[#allocation15_spill] sm:$0xff] }
 0x4b6   :  { %v1674_v0 = vsel %vm62_vm0, %v1658_v61, %v1401_v33  ;;  %v4773_v33 = vld [vmem:[#allocation17_spill] sm:$0xff]  ;;  %v1139_v61 = vpop.xlane.xlu1 %1138 }
 0x4b7   :  { %v3038_v14 = vpop.eup %3037  ;;  %v1692_v36 = vsel %vm1686_vm7, %v1675_v24, %v1643_v12  ;;  %v4777_v12 = vld [vmem:[#allocation11_spill] sm:$0xff] }
 0x4b8   :  { %v1597_v20 = vpop.xlane.xlu0 %1596  ;;  %v1642_v30 = vmul.f32 %v3038_v14, %v4764_v8  ;;  %v3040_v50 = vpop.eup %3039 }
 0x4b9   :  { %v3042_v1 = vpop.eup %3041  ;;  %v923_v14 = vmul.f32 %v3040_v50, %v4775_v25  ;;  %v4778_v50 = vld [vmem:[#allocation40_spill] sm:$0xff]  ;;  %v4786_v25 = vld [vmem:[#allocation37_spill] sm:$0xff] }
 0x4ba   :  { %v1691_v21 = vsel %vm1686_vm7, %v1674_v0, %v1642_v30  ;;  %v3044_v60 = vpop.eup %3043  ;;  %v1164_v52 = vmul.f32 %v3042_v1, %v4769_v4  ;;  %v4779_v1 = vld [vmem:[#allocation49_spill] sm:$0xff] }
 0x4bb   :  { %2605 = vmatprep.mubr.msk.f32.mxu0 %vm1735_vm6, %v1691_v21  ;;  %v3046_v40 = vpop.eup %3045  ;;  %v922_v32 = vmul.f32 %v3044_v60, %v4772_v10  ;;  %v4784_v10 = vld [vmem:[#allocation29_spill] sm:$0xff] }
 0x4bc   :  { %2606 = vmatmul.mubr.msk.f32.gmra.mrb[28].mxu0 %vm1735_vm6, %v1692_v36  ;;  %v4465_v13 = vpop.xlane.xlu0 %1132  ;;  %v3048_v62 = vpop.eup %3047  ;;  %v921_v27 = vmul.f32 %v3046_v40, %v4770_v9  ;;  %v1662_v22 = vsel %vm754_vm5, %v923_v14, %v1164_v52  ;;  %v4780_v40 = vld [vmem:[#allocation50_spill] sm:$0xff]  ;;  %v4781_v52 = vld [vmem:[#allocation27_spill] sm:$0xff] }
 0x4bd   :  { %v3050_v57 = vpop.eup %3049  ;;  %v1163_v39 = vmul.f32 %v3048_v62, %v4767_v15 }
 0x4be   :  { %v3052_v47 = vpop.eup %3051  ;;  %v1162_v63 = vmul.f32 %v3050_v57, %v4766_v54 }
 0x4bf   :  { %v3054_v48 = vpop.eup %3053  ;;  %v1405_v7 = vmul.f32 %v3052_v47, %v4774_v55  ;;  %v1661_v30 = vsel %vm754_vm5, %v922_v32, %v1163_v39 }
 0x4c0   :  { %v1353_v43 = vpop.xlane.xlu0 %1352  ;;  %v1404_v2 = vmul.f32 %v3054_v48, %v4771_v3  ;;  %v1660_v5 = vsel %vm754_vm5, %v921_v27, %v1162_v63  ;;  %v4782_v27 = vld [vmem:[#allocation28_spill] sm:$0xff] }
 0x4c1   :  { %3055 = vrcp.f32 %v1353_v43  ;;  %v1678_v24 = vsel %vm62_vm0, %v1662_v22, %v1405_v7 }
 0x4c2   :  { %3057 = vrcp.f32 %v1597_v20  ;;  %v1677_v0 = vsel %vm62_vm0, %v1661_v30, %v1404_v2  ;;  %v4783_v2 = vld [vmem:[#allocation12_spill] sm:$0xff] }
 0x4c3   :  { %3059 = vrcp.f32 %v4403_v34 }
 0x4c4   :  { %v1594_v37 = vpop.xlane.xlu0 %1593 }
 0x4c5   :  { %3061 = vrcp.f32 %v1594_v37 }
 0x4c6   :  { %3063 = vrcp.f32 %v4778_v50  ;;  %v4791_v50 = vld [vmem:[#allocation46_spill] sm:$0xff] }
 0x4c7   :  { %3065 = vrcp.f32 %v4779_v1 }
 0x4c8   :  { %v1371_v29 = vpop.xlane.xlu0 %1370  ;;  %3067 = vrcp.f32 %v4780_v40 }
 0x4c9   :  { %3069 = vrcp.f32 %v4317_v44 }
 0x4ca   :  { %3071 = vrcp.f32 %v4413_v59 }
 0x4cb   :  { %v3056_v46 = vpop.eup %3055  ;;  %3073 = vrcp.f32 %v4324_v18 }
 0x4cc   :  { %v3058_v19 = vpop.eup %3057  ;;  %v1403_v34 = vmul.f32 %v3056_v46, %v4768_v16  ;;  %v1612_v49 = vpop.xlane.xlu0 %1611  ;;  %3075 = vrcp.f32 %v4427_v17 }
 0x4cd   :  { %v3060_v45 = vpop.eup %3059  ;;  %v1645_v38 = vmul.f32 %v3058_v19, %v4773_v33  ;;  %3077 = vrcp.f32 %v4438_v42 }
 0x4ce   :  { %v1646_v20 = vmul.f32 %v3060_v45, %v4777_v12  ;;  %v1676_v8 = vsel %vm62_vm0, %v1660_v5, %v1403_v34  ;;  %3079 = vrcp.f32 %v4435_v28  ;;  %v4787_v5 = vld [vmem:[#allocation43_spill] sm:$0xff] }
 0x4cf   :  { %v3062_v31 = vpop.eup %3061  ;;  %v1694_v21 = vsel %vm1686_vm7, %v1677_v0, %v1645_v38  ;;  %3081 = vrcp.f32 %v4465_v13  ;;  %v4785_v38 = vld [vmem:[#allocation18_spill] sm:$0xff] }
 0x4d0   :  { %v1644_v51 = vmul.f32 %v3062_v31, %v4776_v56  ;;  %v1380_v6 = vpop.xlane.xlu0 %1379  ;;  %v1695_v36 = vsel %vm1686_vm7, %v1678_v24, %v1646_v20  ;;  %v3064_v48 = vpop.eup %3063  ;;  %3083 = vrcp.f32 %v1130_v41 }
 0x4d1   :  { %v4503_v63 = vpop.eup %3065  ;;  %3085 = vrcp.f32 %v1371_v29  ;;  %v925_v31 = vmul.f32 %v3064_v48, %v4783_v2 }
 0x4d2   :  { %v1693_v26 = vsel %vm1686_vm7, %v1676_v8, %v1644_v51  ;;  %v3068_v59 = vpop.eup %3067  ;;  %3087 = vrcp.f32 %v1612_v49  ;;  %v4788_v8 = vld [vmem:[#allocation38_spill] sm:$0xff] }
 0x4d3   :  { %2608 = vmatprep.mubr.msk.f32.mxu0 %vm1735_vm6, %v1693_v26  ;;  %v3070_v17 = vpop.eup %3069  ;;  %3089 = vrcp.f32 %v4449_v11  ;;  %v4789_v26 = vld [vmem:[#allocation45_spill] sm:$0xff] }
 0x4d4   :  { %2609 = vmatmul.mubr.msk.f32.gmra.mrb[30].mxu0 %vm1735_vm6, %v1694_v21  ;;  %v1621_v37 = vpop.xlane.xlu0 %1620  ;;  %v3072_v42 = vpop.eup %3071  ;;  %v928_v12 = vmul.f32 %v3070_v17, %v4787_v5  ;;  %v4790_v21 = vld [vmem:[#allocation39_spill] sm:$0xff] }
 0x4d5   :  { %2627 = vmatprep.mubr.msk.f32.mxu0 %vm1735_vm6, %v1695_v36  ;;  %v3074_v39 = vpop.eup %3073  ;;  %v1166_v11 = vmul.f32 %v3072_v42, %v4781_v52  ;;  %v4797_v42 = vld [vmem:[#allocation20_spill] sm:$0xff] }
 0x4d6   :  { %v1136_v43 = vpop.xlane.xlu1 %1135  ;;  %v3076_v16 = vpop.eup %3075  ;;  %v927_v0 = vmul.f32 %v3074_v39, %v4789_v26  ;;  %v4799_v39 = vld [vmem:[#allocation30_spill] sm:$0xff] }
 0x4d7   :  { %3091 = vrcp.f32 %v1136_v43  ;;  %v3078_v41 = vpop.eup %3077  ;;  %v1407_v49 = vmul.f32 %v3076_v16, %v4782_v27  ;;  %v1664_v56 = vsel %vm754_vm5, %v925_v31, %v1166_v11 }
 0x4d8   :  { %v3080_v34 = vpop.eup %3079 }
 0x4d9   :  { %v3082_v4 = vpop.eup %3081  ;;  %v1648_v32 = vmul.f32 %v3080_v34, %v4784_v10  ;;  %v1680_v20 = vsel %vm62_vm0, %v1664_v56, %v1407_v49  ;;  %v4800_v34 = vld [vmem:[#allocation25_spill] sm:$0xff] }
 0x4da   :  { %v1377_v60 = vpop.xlane.xlu1 %1376  ;;  %v3084_v9 = vpop.eup %3083  ;;  %v1169_v55 = vmul.f32 %v3082_v4, %v4785_v38 }
 0x4db   :  { %3093 = vrcp.f32 %v1377_v60  ;;  %v3086_v3 = vpop.eup %3085  ;;  %v1168_v14 = vmul.f32 %v3084_v9, %v4786_v25  ;;  %v1697_v22 = vsel %vm1686_vm7, %v1680_v20, %v1648_v32  ;;  %v4792_v60 = vld [vmem:[#allocation19_spill] sm:$0xff] }
 0x4dc   :  { %v3088_v33 = vpop.eup %3087  ;;  %v1409_v30 = vmul.f32 %v3086_v3, %v4788_v8  ;;  %v1667_v36 = vsel %vm754_vm5, %v928_v12, %v1169_v55  ;;  %v1410_v40 = vmul.f32 %v3078_v41, %v4792_v60 }
 0x4dd   :  { %v3090_v7 = vpop.eup %3089  ;;  %v1650_v24 = vmul.f32 %v3088_v33, %v4790_v21 }
 0x4de   :  { %v2839_v62 = vpop.permute.xlu1 %2838  ;;  %v1618_v57 = vpop.xlane.xlu0 %1617 }
 0x4df   :  { %v2841_v46 = vunpack.i.h.bf16 %v2839_v62  ;;  %v2840_v19 = vunpack.i.l.bf16 %v2839_v62  ;;  %3095 = vrcp.f32 %v1618_v57  ;;  %v4793_v57 = vld [vmem:[#allocation47_spill] sm:$0xff] }
 0x4e0   :  { %3097 = vrcp.f32 %v1139_v61 }
 0x4e1   :  { %v2783_v28 = vpack.c.bf16 %v2841_v46, %v2840_v19  ;;  %3099 = vrcp.f32 %v1380_v6  ;;  %v3092_v51 = vpop.eup %3091  ;;  %v4794_v46 = vld [vmem:[#allocation31_spill] sm:$0xff] }
 0x4e2   :  { %v2834_v47 = vpop.permute.xlu0 %2833  ;;  %v2844_v18 = vpop.permute.xlu1 %2843  ;;  %3101 = vrcp.f32 %v1621_v37  ;;  %v1170_v1 = vmul.f32 %v3092_v51, %v4791_v50  ;;  %v1666_v37 = vsel %vm754_vm5, %v927_v0, %v1168_v14  ;;  %v929_v19 = vmul.f32 %v3068_v59, %v4794_v46  ;;  %v4798_v59 = vld [vmem:[#allocation23_spill] sm:$0xff]  ;;  %v2316_v51 = vld [vmem:[%s4647_s9] ss:$0 sm:$0xff] }
 0x4e3   :  { %v2836_v54 = vunpack.i.h.bf16 %v2834_v47  ;;  %v2835_v44 = vunpack.i.l.bf16 %v2834_v47  ;;  %v2846_v13 = vunpack.i.h.bf16 %v2844_v18  ;;  %v2845_v15 = vunpack.i.l.bf16 %v2844_v18 }
 0x4e4   :  { %v1682_v62 = vsel %vm62_vm0, %v1666_v37, %v1409_v30 }
 0x4e5   :  { %v2779_v45 = vpack.c.bf16 %v2836_v54, %v2835_v44  ;;  %v2787_v29 = vpack.c.bf16 %v2846_v13, %v2845_v15  ;;  %v3094_v61 = vpop.eup %3093  ;;  %v1683_v54 = vsel %vm62_vm0, %v1667_v36, %v1410_v40  ;;  %v4795_v44 = vld [vmem:[#allocation48_spill] sm:$0xff]  ;;  %v1668_v13 = vsel %vm754_vm5, %v929_v19, %v1170_v1 }
 0x4e6   :  { %v1411_v47 = vmul.f32 %v3094_v61, %v4793_v57 }
 0x4e7   :  { %2780 = vmatprep.subr.bf16.mxu0 %v2779_v45 }
 0x4e8   :  { %2782 = vmatpush3.bf16.msra.mxu0 %v2779_v45  ;;  %v4796_v45 = vld [vmem:[#allocation21_spill] sm:$0xff]  ;;  %v1684_v41 = vsel %vm62_vm0, %v1668_v13, %v1411_v47 }
 0x4e9   :  { %2784 = vmatprep.subr.bf16.mxu0 %v2783_v28  ;;  %v3096_v6 = vpop.eup %3095 }
 0x4ea   :  { %v3098_v43 = vpop.eup %3097  ;;  %v1652_v18 = vmul.f32 %v3096_v6, %v4795_v44 }
 0x4eb   :  { %v1171_v17 = vmul.f32 %v3098_v43, %v4796_v45 }
 0x4ec   :  { %2786 = vmatpush3.bf16.msra.mxu0 %v2783_v28  ;;  %v1651_v28 = vmul.f32 %v3090_v7, %v4797_v42  ;;  %v1701_v4 = vsel %vm1686_vm7, %v1684_v41, %v1652_v18 }
 0x4ed   :  { %2788 = vmatprep.subr.bf16.mxu0 %v2787_v29 }
 0x4ee   :  { %v1700_v16 = vsel %vm1686_vm7, %v1683_v54, %v1651_v28 }
 0x4f0   :  { %2790 = vmatpush3.bf16.msra.mxu0 %v2787_v29 }
 0x4f1   :  { %2792 = vmatprep.subr.bf16.mxu0 %v4353_v58 }
 0x4f3   :  { %2628 = vmatmul.mubr.msk.f32.vlgmr.msra.gmra.mrb[32].mxu0 %vm1735_vm6, %v4406_v23  ;;  %v3100_v23 = vpop.eup %3099 }
 0x4f4   :  { %2630 = vmatprep.mubr.msk.f32.mxu0 %vm1735_vm6, %v1697_v22  ;;  %2794 = vmatpush3.bf16.msra.mxu0 %v4353_v58  ;;  %v3102_v48 = vpop.eup %3101  ;;  %v1699_v58 = vsel %vm1686_vm7, %v1682_v62, %v1650_v24  ;;  %v1412_v15 = vmul.f32 %v3100_v23, %v4798_v59 }
 0x4f5   :  { %2796 = vmatprep.subr.bf16.mxu0 %v4360_v35  ;;  %v1653_v29 = vmul.f32 %v3102_v48, %v4800_v34 }
 0x4f7   :  { %2631 = vmatmul.mubr.msk.f32.gmra.mrb[34].mxu0 %vm1735_vm6, %v4441_v53  ;;  %v930_v53 = vmul.f32 %v4503_v63, %v4799_v39 }
 0x4f8   :  { %2633 = vmatprep.mubr.msk.f32.mxu0 %vm1735_vm6, %v1699_v58  ;;  %2798 = vmatpush3.bf16.msra.mxu0 %v4360_v35 }
 0x4f9   :  { %v1669_v35 = vsel %vm754_vm5, %v930_v53, %v1171_v17 }
 0x4fa   :  { %v1685_v52 = vsel %vm62_vm0, %v1669_v35, %v1412_v15 }
 0x4fb   :  { %2634 = vmatmul.mubr.msk.f32.gmra.mrb[36].mxu0 %vm1735_vm6, %v1700_v16  ;;  %v1702_v11 = vsel %vm1686_vm7, %v1685_v52, %v1653_v29 }
 0x4fc   :  { %2636 = vmatprep.mubr.msk.f32.mxu0 %vm1735_vm6, %v1701_v4 }
 0x4ff   :  { %2637 = vmatmul.mubr.msk.f32.gmra.mrb[38].mxu0 %vm1735_vm6, %v1702_v11 }
 0x56b   :  { %v2601_v63 = vpop.f32.mrb[24].mxu0 }
 0x56c   :  { %v1826_v9 = vpop.f32.mrb[25].mxu0 }
 0x56d   :  { %2647 = vmatprep.mubr.msk.f32.mxu0 %vm62_vm0, %v1826_v9 }
 0x56e   :  { %2648 = vmatmul.mubr.msk.f32.vlgmr.msra.gmra.mrb[40].mxu0 %vm62_vm0, %v2601_v63 }
 0x577   :  { %v2604_v27 = vpop.f32.mrb[26].mxu0 }
 0x578   :  { %v1836_v49 = vpop.f32.mrb[27].mxu0 }
 0x579   :  { %2650 = vmatprep.mubr.msk.f32.mxu0 %vm62_vm0, %v1836_v49 }
 0x57a   :  { %2651 = vmatmul.mubr.msk.f32.gmra.mrb[42].mxu0 %vm62_vm0, %v2604_v27 }
 0x58f   :  { %v2607_v3 = vpop.f32.mrb[28].mxu0 }
 0x590   :  { %v1846_v2 = vpop.f32.mrb[29].mxu0 }
 0x591   :  { %2653 = vmatprep.mubr.msk.f32.mxu0 %vm62_vm0, %v1846_v2 }
 0x592   :  { %2654 = vmatmul.mubr.msk.f32.gmra.mrb[44].mxu0 %vm62_vm0, %v2607_v3 }
 0x5a7   :  { %v2610_v31 = vpop.f32.mrb[30].mxu0 }
 0x5a8   :  { %v1856_v10 = vpop.f32.mrb[31].mxu0 }
 0x5a9   :  { %2656 = vmatprep.mubr.msk.f32.mxu1 %vm62_vm0, %v1856_v10 }
 0x5aa   :  { %2657 = vmatmul.mubr.msk.f32.vlgmr.msra.gmra.mrb[12].mxu1 %vm62_vm0, %v2610_v31 }
 0x5c6   :  { %v2629_v32 = vpop.f32.mrb[32].mxu0 }
 0x5c7   :  { %v1987_v33 = vpop.f32.mrb[33].mxu0 }
 0x5c8   :  { %2659 = vmatprep.mubr.msk.f32.mxu1 %vm62_vm0, %v1987_v33 }
 0x5c9   :  { %2660 = vmatmul.mubr.msk.f32.gmra.mrb[14].mxu1 %vm62_vm0, %v2629_v32 }
 0x5ca   :  { %v2632_v38 = vpop.f32.mrb[34].mxu0 }
 0x5cb   :  { %v1997_v55 = vpop.f32.mrb[35].mxu0 }
 0x5cc   :  { %2662 = vmatprep.mubr.msk.f32.mxu1 %vm62_vm0, %v1997_v55 }
 0x5cd   :  { %2663 = vmatmul.mubr.msk.f32.gmra.mrb[16].mxu1 %vm62_vm0, %v2632_v38 }
 0x5ce   :  { %v2635_v7 = vpop.f32.mrb[36].mxu0 }
 0x5cf   :  { %v2007_v25 = vpop.f32.mrb[37].mxu0 }
 0x5d0   :  { %2665 = vmatprep.mubr.msk.f32.mxu1 %vm62_vm0, %v2007_v25 }
 0x5d1   :  { %2666 = vmatmul.mubr.msk.f32.gmra.mrb[18].mxu1 %vm62_vm0, %v2635_v7 }
 0x5d2   :  { %v2638_v14 = vpop.f32.mrb[38].mxu0 }
 0x5d3   :  { %v2017_v56 = vpop.f32.mrb[39].mxu0 }
 0x5d4   :  { %2668 = vmatprep.mubr.msk.f32.mxu1 %vm62_vm0, %v2017_v56 }
 0x5d5   :  { %2669 = vmatmul.mubr.msk.f32.gmra.mrb[20].mxu1 %vm62_vm0, %v2638_v14 }
 0x641   :  { %v2649_v5 = vpop.f32.mrb[40].mxu0 }
 0x642   :  { %v2157_v12 = vadd.f32 %v2649_v5, %v2316_v51  ;;  %v2151_v20 = vpop.f32.mrb[41].mxu0 }
 0x643   :  { %v2152_v8 = vadd.f32 %v2316_v51, %v2151_v20 }
 0x644   :  { %2231 = vst.msk [vmem:[%s4648_s10 + $0x8] sm:$0xff] %vm62_vm0, %v2157_v12 }
 0x645   :  { %2230 = vst.msk [vmem:[%s4648_s10] sm:$0xff] %vm62_vm0, %v2152_v8 }
 0x64d   :  { %v2652_v30 = vpop.f32.mrb[42].mxu0 }
 0x64e   :  { %v2167_v61 = vadd.f32 %v2652_v30, %v2316_v51  ;;  %v2161_v26 = vpop.f32.mrb[43].mxu0 }
 0x64f   :  { %v2162_v0 = vadd.f32 %v2316_v51, %v2161_v26 }
 0x650   :  { %2233 = vst.msk [vmem:[%s4648_s10 + $0x18] sm:$0xff] %vm62_vm0, %v2167_v61 }
 0x651   :  { %2232 = vst.msk [vmem:[%s4648_s10 + $0x10] sm:$0xff] %vm62_vm0, %v2162_v0 }
 0x665   :  { %v2655_v22 = vpop.f32.mrb[44].mxu0 }
 0x666   :  { %v2177_v21 = vadd.f32 %v2655_v22, %v2316_v51  ;;  %v2171_v24 = vpop.f32.mrb[45].mxu0 }
 0x667   :  { %v2172_v6 = vadd.f32 %v2316_v51, %v2171_v24 }
 0x668   :  { %2235 = vst.msk [vmem:[%s4648_s10 + $0x28] sm:$0xff] %vm62_vm0, %v2177_v21 }
 0x669   :  { %2234 = vst.msk [vmem:[%s4648_s10 + $0x20] sm:$0xff] %vm62_vm0, %v2172_v6 }
 0x67d   :  { %v2658_v36 = vpop.f32.mrb[12].mxu1 }
 0x67e   :  { %v2187_v43 = vadd.f32 %v2658_v36, %v2316_v51  ;;  %v2181_v50 = vpop.f32.mrb[13].mxu1 }
 0x67f   :  { %v2182_v1 = vadd.f32 %v2316_v51, %v2181_v50 }
 0x680   :  { %2237 = vst.msk [vmem:[%s4648_s10 + $0x38] sm:$0xff] %vm62_vm0, %v2187_v43 }
 0x681   :  { %2236 = vst.msk [vmem:[%s4648_s10 + $0x30] sm:$0xff] %vm62_vm0, %v2182_v1 }
 0x69c   :  { %v2661_v37 = vpop.f32.mrb[14].mxu1 }
 0x69d   :  { %v2197_v60 = vadd.f32 %v2661_v37, %v2316_v51  ;;  %v2191_v40 = vpop.f32.mrb[15].mxu1 }
 0x69e   :  { %v2192_v23 = vadd.f32 %v2316_v51, %v2191_v40 }
 0x69f   :  { %2239 = vst.msk [vmem:[%s4648_s10 + $0x48] sm:$0xff] %vm62_vm0, %v2197_v60 }
 0x6a0   :  { %2238 = vst.msk [vmem:[%s4648_s10 + $0x40] sm:$0xff] %vm62_vm0, %v2192_v23  ;;  %v2664_v62 = vpop.f32.mrb[16].mxu1 }
 0x6a1   :  { %v2207_v57 = vadd.f32 %v2664_v62, %v2316_v51  ;;  %v2201_v47 = vpop.f32.mrb[17].mxu1 }
 0x6a2   :  { %v2202_v48 = vadd.f32 %v2316_v51, %v2201_v47 }
 0x6a3   :  { %2241 = vst.msk [vmem:[%s4648_s10 + $0x58] sm:$0xff] %vm62_vm0, %v2207_v57 }
 0x6a4   :  { %2240 = vst.msk [vmem:[%s4648_s10 + $0x50] sm:$0xff] %vm62_vm0, %v2202_v48  ;;  %v2667_v46 = vpop.f32.mrb[18].mxu1 }
 0x6a5   :  { %v2217_v19 = vadd.f32 %v2667_v46, %v2316_v51  ;;  %v2211_v58 = vpop.f32.mrb[19].mxu1 }
 0x6a6   :  { %v2212_v54 = vadd.f32 %v2316_v51, %v2211_v58 }
 0x6a7   :  { %2243 = vst.msk [vmem:[%s4648_s10 + $0x68] sm:$0xff] %vm62_vm0, %v2217_v19 }
 0x6a8   :  { %2242 = vst.msk [vmem:[%s4648_s10 + $0x60] sm:$0xff] %vm62_vm0, %v2212_v54  ;;  %v2670_v44 = vpop.f32.mrb[20].mxu1 }
 0x6a9   :  { %v2227_v18 = vadd.f32 %v2670_v44, %v2316_v51  ;;  %v2221_v45 = vpop.f32.mrb[21].mxu1 }
 0x6aa   :  { %v2222_v17 = vadd.f32 %v2316_v51, %v2221_v45 }
 0x6ab   :  { %2245 = vst.msk [vmem:[%s4648_s10 + $0x78] sm:$0xff] %vm62_vm0, %v2227_v18 }
 0x6ac   :  { %2244 = vst.msk [vmem:[%s4648_s10 + $0x70] sm:$0xff] %vm62_vm0, %v2222_v17 }

</bundles_post_ra>
